<compile_context>
chip_gen: v7x
topology: tpu7x:2x2x1
jax: 0.10.0
libtpu: 0.0.40
codegen_flags: <defaults>
</compile_context>

<pallas_src>
import jax
import jax.numpy as jnp
import numpy as np
from jax.experimental import pallas as pl
from jax.experimental.pallas import tpu as pltpu


def _round_up(x, m):
    return ((x + m - 1) // m) * m


# ----------------------------- kernel -----------------------------
def _make_lstm_kernel(*, num_layers, hidden_size, seq_len, t_chunk, b_pad, unroll):
    H, T, L = hidden_size, seq_len, num_layers
    TC, B = t_chunk, b_pad
    G = 4 * H

    def lstm_cell(gates, c_prev):
        # Gate columns pre-permuted to (i, f, o, g): one contiguous sigmoid
        # over 3H lanes + one tanh -> 2 EUP pushes per layer per step.
        sig = jax.nn.sigmoid(gates[:, :3 * H])
        i_g = sig[:, 0 * H:1 * H]
        f_g = sig[:, 1 * H:2 * H]
        o_g = sig[:, 2 * H:3 * H]
        g_g = jnp.tanh(gates[:, 3 * H:])
        c_new = f_g * c_prev + i_g * g_g
        h_new = o_g * jnp.tanh(c_new)
        return h_new, c_new

    def kernel(*refs):
        # refs layout:
        #   x_ref (TC*B, F)  -- this time chunk, time-major, batch-padded
        #   w_ih0 (F, 4H), w_hh0 (H, 4H), b0 (1, 4H)
        #   [w_ih_l (H, 4H), w_hh_l (H, 4H), b_l (1, 4H)]  for l = 1..L-1
        #   fc_w (1, H), fc_b (1, 1)
        #   out_ref (B, 1)
        #   scratch: xproj (TC*B, 4H), h_scr (L, B, H), c_scr (L, B, H)
        x_ref = refs[0]
        w_ih0_ref, w_hh0_ref, b0_ref = refs[1], refs[2], refs[3]
        pos = 4
        deep_refs = []
        for _ in range(L - 1):
            deep_refs.append((refs[pos], refs[pos + 1], refs[pos + 2]))
            pos += 3
        fc_w_ref, fc_b_ref = refs[pos], refs[pos + 1]
        out_ref = refs[pos + 2]
        xproj_scr, h_scr, c_scr = refs[pos + 3], refs[pos + 4], refs[pos + 5]

        chunk = pl.program_id(0)

        # Recurrent state lives in VMEM scratch across time chunks.
        @pl.when(chunk == 0)
        def _():
            h_scr[...] = jnp.zeros_like(h_scr)
            c_scr[...] = jnp.zeros_like(c_scr)

        # ---- layer-0 input projection for the whole chunk: one MXU matmul ----
        xproj_scr[...] = (
            jnp.dot(x_ref[...], w_ih0_ref[...], preferred_element_type=jnp.float32)
            + b0_ref[...]
        )

        # ---- hoist weight loads / bias broadcasts out of the recurrence ----
        w_hh0 = w_hh0_ref[...]
        deep_w = [
            (w_ih_ref[...], w_hh_ref[...], jnp.broadcast_to(b_ref[...], (B, G)))
            for (w_ih_ref, w_hh_ref, b_ref) in deep_refs
        ]

        init_hs = tuple(h_scr[l] for l in range(L))
        init_cs = tuple(c_scr[l] for l in range(L))

        # ---- layer-wavefront recurrence --------------------------------------
        # Global iteration k_g computes layer l at time (k_g - l).  All layers
        # read only the previous iteration's carries, so the per-iteration
        # matmuls are independent and pipeline in the MXU.  Iterations where a
        # layer has no valid timestep (head fill / padded tail) keep the carry
        # unchanged via a cheap scalar-predicated select.
        def step(k_local, carry):
            hs, cs = carry
            k_g = chunk * TC + k_local

            new_hs, new_cs = [], []

            # Layer 0 (time t = k_g): input part precomputed; only the
            # h-recurrence matmul is on the serial chain.  B = 8 -> the xproj
            # slice is an aligned (8, 128) tile load.
            row = pl.multiple_of(k_local * B, 8)
            gates0 = xproj_scr[pl.ds(row, B), :] + jnp.dot(
                hs[0], w_hh0, preferred_element_type=jnp.float32)
            h0, c0 = lstm_cell(gates0, cs[0])
            valid0 = k_g < T
            new_hs.append(jnp.where(valid0, h0, hs[0]))
            new_cs.append(jnp.where(valid0, c0, cs[0]))

            # Layers >= 1 (time t = k_g - l): consume the lower layer's output
            # from the PREVIOUS iteration (hs[l-1]) -> independent of layer 0
            # this iteration.  No lane concat: two small MXU pushes.
            for l in range(1, L):
                w_ih, w_hh, b_full = deep_w[l - 1]
                gates = (
                    jnp.dot(hs[l - 1], w_ih, preferred_element_type=jnp.float32)
                    + jnp.dot(hs[l], w_hh, preferred_element_type=jnp.float32)
                    + b_full
                )
                h, c = lstm_cell(gates, cs[l])
                valid = jnp.logical_and(k_g >= l, k_g - l < T)
                new_hs.append(jnp.where(valid, h, hs[l]))
                new_cs.append(jnp.where(valid, c, cs[l]))

            return tuple(new_hs), tuple(new_cs)

        hs_f, cs_f = jax.lax.fori_loop(0, TC, step, (init_hs, init_cs),
                                       unroll=unroll)

        for l in range(L):
            h_scr[l] = hs_f[l]
            c_scr[l] = cs_f[l]

        # ---- final fc on the top layer's last hidden state -------------------
        # VPU multiply + lane reduction instead of an N=1 MXU matmul.
        @pl.when(chunk == pl.num_programs(0) - 1)
        def _():
            h_top = h_scr[L - 1]                                    # (B, H)
            out_ref[...] = (
                jnp.sum(h_top * fc_w_ref[...], axis=-1, keepdims=True)
                + fc_b_ref[...]
            )

    return kernel


# ----------------------------- wrapper -----------------------------
def _permute_gates(w):
    """Reorder last-dim gate blocks from PyTorch (i,f,g,o) to (i,f,o,g)."""
    H = w.shape[-1] // 4
    return jnp.concatenate(
        [w[..., : 2 * H], w[..., 3 * H:], w[..., 2 * H:3 * H]], axis=-1
    )


def forex_lstm_forward(x_btf, params, *, num_layers, hidden_size, max_chunk=128):
    """x_btf: (B, T, F) float32 (batch_first, like the PyTorch module)."""
    B, T, F = x_btf.shape
    H = hidden_size
    L = num_layers

    # Fill the sublane dimension with batch (padded rows are discarded).
    B_pad = max(8, _round_up(B, 8))

    # Time-chunk sizing.  The wavefront needs T + L - 1 iterations total; time
    # is zero-padded (masked in-kernel) so every chunk runs the same static
    # trip count, and max_chunk bounds per-chunk VMEM for long sequences.
    UNROLL = 4
    max_chunk = _round_up(max_chunk, UNROLL)
    T_needed = T + L - 1
    T_chunk = min(_round_up(T_needed, UNROLL), max_chunk)
    num_chunks = -(-T_needed // T_chunk)
    T_pad = num_chunks * T_chunk
    unroll = True if T_chunk <= 16 else UNROLL

    # Time-major, zero-pad time/batch, flatten rows so layer 0's input
    # projection is one matmul per chunk.
    x_tbf = jnp.transpose(x_btf, (1, 0, 2))                       # (T, B, F)
    x_tbf = jnp.pad(x_tbf, ((0, T_pad - T), (0, B_pad - B), (0, 0)))
    x_flat = x_tbf.reshape(T_pad * B_pad, F)

    layers = params["layers"]
    w_ih0, w_hh0, b0 = layers[0]
    flat_inputs = [
        x_flat,
        _permute_gates(w_ih0),          # (F, 4H)
        _permute_gates(w_hh0),          # (H, 4H)
        _permute_gates(b0),             # (1, 4H)
    ]
    for l in range(1, L):
        w_ih, w_hh, b = layers[l]
        flat_inputs += [_permute_gates(w_ih), _permute_gates(w_hh),
                        _permute_gates(b)]

    fc_w_T, fc_b = params["fc"]          # (H, 1), (1, 1)
    flat_inputs += [fc_w_T.T, fc_b]      # fc weight as a (1, H) row

    kernel = _make_lstm_kernel(
        num_layers=L, hidden_size=H, seq_len=T,
        t_chunk=T_chunk, b_pad=B_pad, unroll=unroll)

    # x streams per chunk (Pallas double-buffers it); weights map to the same
    # block every grid step so they stay resident.
    in_specs = [pl.BlockSpec((T_chunk * B_pad, F), lambda c: (c, 0))]
    for a in flat_inputs[1:]:
        in_specs.append(pl.BlockSpec(a.shape, lambda c: (0, 0)))
    out_spec = pl.BlockSpec((B_pad, 1), lambda c: (0, 0))

    out_padded = pl.pallas_call(
        kernel,
        grid=(num_chunks,),
        out_shape=jax.ShapeDtypeStruct((B_pad, 1), jnp.float32),
        in_specs=in_specs,
        out_specs=out_spec,
        scratch_shapes=[
            pltpu.VMEM((T_chunk * B_pad, 4 * H), jnp.float32),  # chunk x-proj
            pltpu.VMEM((L, B_pad, H), jnp.float32),             # h carry
            pltpu.VMEM((L, B_pad, H), jnp.float32),             # c carry
        ],
        compiler_params=pltpu.CompilerParams(
            # The chunk axis carries the recurrence in scratch -> sequential.
            dimension_semantics=("arbitrary",),
        ),
    )(*flat_inputs)

    return out_padded[:B]


# ----------------------------- parameter init -----------------------------
def _xavier_uniform(key, fan_out, fan_in):
    bound = float(np.sqrt(6.0 / (fan_in + fan_out)))
    # PyTorch weight shape is (fan_out, fan_in); we store the transpose for x @ W^T.
    w = jax.random.uniform(key, (fan_out, fan_in), jnp.float32, -bound, bound)
    return w.T  # (fan_in, fan_out)


def init_params(key, input_size, hidden_size, num_layers):
    H = hidden_size
    layers = []
    for l in range(num_layers):
        in_dim = input_size if l == 0 else H
        key, k1, k2 = jax.random.split(key, 3)
        w_ih_T = _xavier_uniform(k1, 4 * H, in_dim)          # (in_dim, 4H)
        w_hh_T = _xavier_uniform(k2, 4 * H, H)               # (H, 4H)
        b = jnp.zeros((1, 4 * H), jnp.float32)               # b_ih + b_hh, both 0
        layers.append((w_ih_T, w_hh_T, b))
    key, kfc = jax.random.split(key)
    fc_w_T = _xavier_uniform(kfc, 1, H)                      # (H, 1)
    fc_b = jnp.zeros((1, 1), jnp.float32)
    return {"layers": layers, "fc": (fc_w_T, fc_b)}


# ----------------------------- pure-JAX reference -----------------------------
def forex_lstm_reference(x_btf, params, *, num_layers, hidden_size):
    B, T, F = x_btf.shape
    H = hidden_size
    h = [jnp.zeros((B, H), jnp.float32) for _ in range(num_layers)]
    c = [jnp.zeros((B, H), jnp.float32) for _ in range(num_layers)]
    last = None
    for t in range(T):
        inp = x_btf[:, t, :]
        for l in range(num_layers):
            w_ih_T, w_hh_T, b = params["layers"][l]
            gates = inp @ w_ih_T + h[l] @ w_hh_T + b
            i_g = jax.nn.sigmoid(gates[:, 0 * H:1 * H])
            f_g = jax.nn.sigmoid(gates[:, 1 * H:2 * H])
            g_g = jnp.tanh(gates[:, 2 * H:3 * H])
            o_g = jax.nn.sigmoid(gates[:, 3 * H:4 * H])
            c[l] = f_g * c[l] + i_g * g_g
            h[l] = o_g * jnp.tanh(c[l])
            inp = h[l]
        last = inp
    fc_w_T, fc_b = params["fc"]
    return last @ fc_w_T + fc_b


if __name__ == "__main__":
    INPUT_SIZE = 16
    HIDDEN_SIZE = 32
    NUM_LAYERS = 2
    B, T = 2, 8

    key = jax.random.PRNGKey(0)
    key, kx = jax.random.split(key)
    x = jax.random.normal(kx, (B, T, INPUT_SIZE), jnp.float32)
    params = init_params(key, INPUT_SIZE, HIDDEN_SIZE, NUM_LAYERS)

    out = jax.block_until_ready(
        forex_lstm_forward(x, params, num_layers=NUM_LAYERS, hidden_size=HIDDEN_SIZE)
    )
    ref = forex_lstm_reference(
        x, params, num_layers=NUM_LAYERS, hidden_size=HIDDEN_SIZE
    )
    np.testing.assert_allclose(
        np.asarray(out), np.asarray(ref), rtol=1e-5, atol=1e-5
    )
    assert out.shape == (B, 1)

    # Exercise the multi-chunk streamed path: T=20 with 8-step chunks ->
    # 3 grid steps, h/c carried across chunks in VMEM scratch, wavefront
    # drain handled by the masked padded iterations.
    key, kx2 = jax.random.split(key)
    T2 = 20
    x2 = jax.random.normal(kx2, (B, T2, INPUT_SIZE), jnp.float32)
    out2 = jax.block_until_ready(
        forex_lstm_forward(x2, params, num_layers=NUM_LAYERS,
                           hidden_size=HIDDEN_SIZE, max_chunk=8)
    )
    ref2 = forex_lstm_reference(
        x2, params, num_layers=NUM_LAYERS, hidden_size=HIDDEN_SIZE
    )
    np.testing.assert_allclose(
        np.asarray(out2), np.asarray(ref2), rtol=1e-4, atol=1e-4
    )

    print("KERNEL_OK")
</pallas_src>

<mosaic_0001>
module attributes {stable_mosaic.version = 11 : i64} {
  func.func @kernel(%arg0: i32, %arg1: memref<96x16xf32, #tpu.memory_space<vmem>>, %arg2: memref<16x128xf32, #tpu.memory_space<vmem>>, %arg3: memref<32x128xf32, #tpu.memory_space<vmem>>, %arg4: memref<1x128xf32, #tpu.memory_space<vmem>>, %arg5: memref<32x128xf32, #tpu.memory_space<vmem>>, %arg6: memref<32x128xf32, #tpu.memory_space<vmem>>, %arg7: memref<1x128xf32, #tpu.memory_space<vmem>>, %arg8: memref<1x32xf32, #tpu.memory_space<vmem>>, %arg9: memref<1x1xf32, #tpu.memory_space<vmem>>, %arg10: memref<8x1xf32, #tpu.memory_space<vmem>>, %arg11: memref<96x128xf32, #tpu.memory_space<vmem>>, %arg12: memref<2x8x32xf32, #tpu.memory_space<vmem>>, %arg13: memref<2x8x32xf32, #tpu.memory_space<vmem>>) attributes {dimension_semantics = [#tpu.dimension_semantics<arbitrary>], iteration_bounds = array<i64: 1>, scalar_prefetch = 0 : i64, scratch_operands = 3 : i64, tpu.core_type = #tpu.core_type<tc>, window_params = [{transform_indices = @transform_0, window_bounds = array<i64: 96, 16>}, {pipeline_mode = #tpu.pipeline_mode<synchronous>, transform_indices = @transform_1, window_bounds = array<i64: 16, 128>}, {pipeline_mode = #tpu.pipeline_mode<synchronous>, transform_indices = @transform_2, window_bounds = array<i64: 32, 128>}, {pipeline_mode = #tpu.pipeline_mode<synchronous>, transform_indices = @transform_3, window_bounds = array<i64: 1, 128>}, {pipeline_mode = #tpu.pipeline_mode<synchronous>, transform_indices = @transform_4, window_bounds = array<i64: 32, 128>}, {pipeline_mode = #tpu.pipeline_mode<synchronous>, transform_indices = @transform_5, window_bounds = array<i64: 32, 128>}, {pipeline_mode = #tpu.pipeline_mode<synchronous>, transform_indices = @transform_6, window_bounds = array<i64: 1, 128>}, {pipeline_mode = #tpu.pipeline_mode<synchronous>, transform_indices = @transform_7, window_bounds = array<i64: 1, 32>}, {pipeline_mode = #tpu.pipeline_mode<synchronous>, transform_indices = @transform_8, window_bounds = array<i64: 1, 1>}, {pipeline_mode = #tpu.pipeline_mode<synchronous>, transform_indices = @transform_9, window_bounds = array<i64: 8, 1>}]} {
    %c0_i32 = arith.constant 0 : i32
    %0 = arith.cmpi eq, %arg0, %c0_i32 : i32
    %1 = arith.extui %0 : i1 to i32
    %c0_i32_0 = arith.constant 0 : i32
    %2 = arith.cmpi ne, %1, %c0_i32_0 : i32
    scf.if %2 {
      %cst_186 = arith.constant 0.000000e+00 : f32
      %675 = vector.broadcast %cst_186 : f32 to vector<2x8x32xf32>
      %c0_187 = arith.constant 0 : index
      %c0_188 = arith.constant 0 : index
      %c0_189 = arith.constant 0 : index
      %676 = vector.load %arg12[%c0_187, %c0_188, %c0_189] : memref<2x8x32xf32, #tpu.memory_space<vmem>>, vector<2x8x32xf32>
      tpu.vector_store %arg12[%c0_187, %c0_188, %c0_189], %675 {strides = array<i32>} : memref<2x8x32xf32, #tpu.memory_space<vmem>>, vector<2x8x32xf32>,
      %cst_190 = arith.constant 0.000000e+00 : f32
      %677 = vector.broadcast %cst_190 : f32 to vector<2x8x32xf32>
      %c0_191 = arith.constant 0 : index
      %c0_192 = arith.constant 0 : index
      %c0_193 = arith.constant 0 : index
      %678 = vector.load %arg13[%c0_191, %c0_192, %c0_193] : memref<2x8x32xf32, #tpu.memory_space<vmem>>, vector<2x8x32xf32>
      tpu.vector_store %arg13[%c0_191, %c0_192, %c0_193], %677 {strides = array<i32>} : memref<2x8x32xf32, #tpu.memory_space<vmem>>, vector<2x8x32xf32>,
    } else {
    }
    %c0 = arith.constant 0 : index
    %c0_1 = arith.constant 0 : index
    %3 = vector.load %arg1[%c0, %c0_1] : memref<96x16xf32, #tpu.memory_space<vmem>>, vector<96x16xf32>
    %c0_2 = arith.constant 0 : index
    %c0_3 = arith.constant 0 : index
    %4 = vector.load %arg2[%c0_2, %c0_3] : memref<16x128xf32, #tpu.memory_space<vmem>>, vector<16x128xf32>
    %cst = arith.constant dense<0.000000e+00> : vector<96x128xf32>
    %5 = tpu.matmul %3, %4, %cst {dimension_numbers = #tpu.dot_dimension_numbers<[1], [0], [0], [1], [0, 0, 1, 1], [], []>} : vector<96x16xf32>, vector<16x128xf32>, vector<96x128xf32> -> vector<96x128xf32>
    %c0_4 = arith.constant 0 : index
    %c0_5 = arith.constant 0 : index
    %6 = vector.load %arg4[%c0_4, %c0_5] : memref<1x128xf32, #tpu.memory_space<vmem>>, vector<1x128xf32>
    %7 = vector.broadcast %6 : vector<1x128xf32> to vector<96x128xf32>
    %8 = arith.addf %5, %7 : vector<96x128xf32>
    %c0_6 = arith.constant 0 : index
    %c0_7 = arith.constant 0 : index
    %9 = vector.load %arg11[%c0_6, %c0_7] : memref<96x128xf32, #tpu.memory_space<vmem>>, vector<96x128xf32>
    tpu.vector_store %arg11[%c0_6, %c0_7], %8 {strides = array<i32>} : memref<96x128xf32, #tpu.memory_space<vmem>>, vector<96x128xf32>,
    %c0_8 = arith.constant 0 : index
    %c0_9 = arith.constant 0 : index
    %10 = vector.load %arg3[%c0_8, %c0_9] : memref<32x128xf32, #tpu.memory_space<vmem>>, vector<32x128xf32>
    %c0_10 = arith.constant 0 : index
    %c0_11 = arith.constant 0 : index
    %11 = vector.load %arg5[%c0_10, %c0_11] : memref<32x128xf32, #tpu.memory_space<vmem>>, vector<32x128xf32>
    %c0_12 = arith.constant 0 : index
    %c0_13 = arith.constant 0 : index
    %12 = vector.load %arg6[%c0_12, %c0_13] : memref<32x128xf32, #tpu.memory_space<vmem>>, vector<32x128xf32>
    %c0_14 = arith.constant 0 : index
    %c0_15 = arith.constant 0 : index
    %13 = vector.load %arg7[%c0_14, %c0_15] : memref<1x128xf32, #tpu.memory_space<vmem>>, vector<1x128xf32>
    %14 = vector.shape_cast %13 : vector<1x128xf32> to vector<1x128xf32>
    %15 = vector.broadcast %14 : vector<1x128xf32> to vector<8x128xf32>
    %c0_16 = arith.constant 0 : index
    %c0_17 = arith.constant 0 : index
    %c0_18 = arith.constant 0 : index
    %16 = vector.load %arg12[%c0_16, %c0_17, %c0_18] : memref<2x8x32xf32, #tpu.memory_space<vmem>>, vector<1x8x32xf32>
    %17 = vector.shape_cast %16 : vector<1x8x32xf32> to vector<8x32xf32>
    %c1 = arith.constant 1 : index
    %c0_19 = arith.constant 0 : index
    %c0_20 = arith.constant 0 : index
    %18 = vector.load %arg12[%c1, %c0_19, %c0_20] : memref<2x8x32xf32, #tpu.memory_space<vmem>>, vector<1x8x32xf32>
    %19 = vector.shape_cast %18 : vector<1x8x32xf32> to vector<8x32xf32>
    %c0_21 = arith.constant 0 : index
    %c0_22 = arith.constant 0 : index
    %c0_23 = arith.constant 0 : index
    %20 = vector.load %arg13[%c0_21, %c0_22, %c0_23] : memref<2x8x32xf32, #tpu.memory_space<vmem>>, vector<1x8x32xf32>
    %21 = vector.shape_cast %20 : vector<1x8x32xf32> to vector<8x32xf32>
    %c1_24 = arith.constant 1 : index
    %c0_25 = arith.constant 0 : index
    %c0_26 = arith.constant 0 : index
    %22 = vector.load %arg13[%c1_24, %c0_25, %c0_26] : memref<2x8x32xf32, #tpu.memory_space<vmem>>, vector<1x8x32xf32>
    %23 = vector.shape_cast %22 : vector<1x8x32xf32> to vector<8x32xf32>
    %c0_i32_27 = arith.constant 0 : i32
    %c12_i32 = arith.constant 12 : i32
    %24 = arith.muli %arg0, %c12_i32 : i32
    %25 = arith.addi %24, %c0_i32_27 : i32
    %c8_i32 = arith.constant 8 : i32
    %26 = arith.muli %c0_i32_27, %c8_i32 : i32
    %27 = tpu.assume_multiple %26, 8 : i32
    %28 = arith.index_cast %27 : i32 to index
    %c0_28 = arith.constant 0 : index
    %29 = vector.load %arg11[%28, %c0_28] : memref<96x128xf32, #tpu.memory_space<vmem>>, vector<8x128xf32>
    %cst_29 = arith.constant dense<0.000000e+00> : vector<8x128xf32>
    %30 = tpu.matmul %17, %10, %cst_29 {dimension_numbers = #tpu.dot_dimension_numbers<[1], [0], [0], [1], [0, 0, 1, 1], [], []>} : vector<8x32xf32>, vector<32x128xf32>, vector<8x128xf32> -> vector<8x128xf32>
    %31 = arith.addf %29, %30 : vector<8x128xf32>
    %32 = vector.extract_strided_slice %31 {offsets = [0, 0], sizes = [8, 96], strides = [1, 1]} : vector<8x128xf32> to vector<8x96xf32>
    %33 = arith.negf %32 : vector<8x96xf32>
    %34 = math.exp %33 : vector<8x96xf32>
    %cst_30 = arith.constant 1.000000e+00 : f32
    %35 = vector.broadcast %cst_30 : f32 to vector<8x96xf32>
    %36 = arith.addf %35, %34 : vector<8x96xf32>
    %37 = arith.divf %35, %36 : vector<8x96xf32>
    %38 = vector.extract_strided_slice %37 {offsets = [0, 0], sizes = [8, 32], strides = [1, 1]} : vector<8x96xf32> to vector<8x32xf32>
    %39 = vector.extract_strided_slice %37 {offsets = [0, 32], sizes = [8, 32], strides = [1, 1]} : vector<8x96xf32> to vector<8x32xf32>
    %40 = vector.extract_strided_slice %37 {offsets = [0, 64], sizes = [8, 32], strides = [1, 1]} : vector<8x96xf32> to vector<8x32xf32>
    %41 = vector.extract_strided_slice %31 {offsets = [0, 96], sizes = [8, 32], strides = [1, 1]} : vector<8x128xf32> to vector<8x32xf32>
    %42 = math.tanh %41 : vector<8x32xf32>
    %43 = arith.mulf %39, %21 : vector<8x32xf32>
    %44 = arith.mulf %38, %42 : vector<8x32xf32>
    %45 = arith.addf %43, %44 : vector<8x32xf32>
    %46 = math.tanh %45 : vector<8x32xf32>
    %47 = arith.mulf %40, %46 : vector<8x32xf32>
    %c8_i32_31 = arith.constant 8 : i32
    %48 = arith.cmpi slt, %25, %c8_i32_31 : i32
    %49 = arith.select %48, %47, %17 : vector<8x32xf32>
    %50 = arith.select %48, %45, %21 : vector<8x32xf32>
    %cst_32 = arith.constant dense<0.000000e+00> : vector<8x128xf32>
    %51 = tpu.matmul %17, %11, %cst_32 {dimension_numbers = #tpu.dot_dimension_numbers<[1], [0], [0], [1], [0, 0, 1, 1], [], []>} : vector<8x32xf32>, vector<32x128xf32>, vector<8x128xf32> -> vector<8x128xf32>
    %cst_33 = arith.constant dense<0.000000e+00> : vector<8x128xf32>
    %52 = tpu.matmul %19, %12, %cst_33 {dimension_numbers = #tpu.dot_dimension_numbers<[1], [0], [0], [1], [0, 0, 1, 1], [], []>} : vector<8x32xf32>, vector<32x128xf32>, vector<8x128xf32> -> vector<8x128xf32>
    %53 = arith.addf %51, %52 : vector<8x128xf32>
    %54 = arith.addf %53, %15 : vector<8x128xf32>
    %55 = vector.extract_strided_slice %54 {offsets = [0, 0], sizes = [8, 96], strides = [1, 1]} : vector<8x128xf32> to vector<8x96xf32>
    %56 = arith.negf %55 : vector<8x96xf32>
    %57 = math.exp %56 : vector<8x96xf32>
    %cst_34 = arith.constant 1.000000e+00 : f32
    %58 = vector.broadcast %cst_34 : f32 to vector<8x96xf32>
    %59 = arith.addf %58, %57 : vector<8x96xf32>
    %60 = arith.divf %58, %59 : vector<8x96xf32>
    %61 = vector.extract_strided_slice %60 {offsets = [0, 0], sizes = [8, 32], strides = [1, 1]} : vector<8x96xf32> to vector<8x32xf32>
    %62 = vector.extract_strided_slice %60 {offsets = [0, 32], sizes = [8, 32], strides = [1, 1]} : vector<8x96xf32> to vector<8x32xf32>
    %63 = vector.extract_strided_slice %60 {offsets = [0, 64], sizes = [8, 32], strides = [1, 1]} : vector<8x96xf32> to vector<8x32xf32>
    %64 = vector.extract_strided_slice %54 {offsets = [0, 96], sizes = [8, 32], strides = [1, 1]} : vector<8x128xf32> to vector<8x32xf32>
    %65 = math.tanh %64 : vector<8x32xf32>
    %66 = arith.mulf %62, %23 : vector<8x32xf32>
    %67 = arith.mulf %61, %65 : vector<8x32xf32>
    %68 = arith.addf %66, %67 : vector<8x32xf32>
    %69 = math.tanh %68 : vector<8x32xf32>
    %70 = arith.mulf %63, %69 : vector<8x32xf32>
    %c1_i32 = arith.constant 1 : i32
    %71 = arith.cmpi sge, %25, %c1_i32 : i32
    %c1_i32_35 = arith.constant 1 : i32
    %72 = arith.subi %25, %c1_i32_35 : i32
    %c8_i32_36 = arith.constant 8 : i32
    %73 = arith.cmpi slt, %72, %c8_i32_36 : i32
    %74 = arith.andi %71, %73 : i1
    %75 = arith.select %74, %70, %19 : vector<8x32xf32>
    %76 = arith.select %74, %68, %23 : vector<8x32xf32>
    %c1_i32_37 = arith.constant 1 : i32
    %c12_i32_38 = arith.constant 12 : i32
    %77 = arith.muli %arg0, %c12_i32_38 : i32
    %78 = arith.addi %77, %c1_i32_37 : i32
    %c8_i32_39 = arith.constant 8 : i32
    %79 = arith.muli %c1_i32_37, %c8_i32_39 : i32
    %80 = tpu.assume_multiple %79, 8 : i32
    %81 = arith.index_cast %80 : i32 to index
    %c0_40 = arith.constant 0 : index
    %82 = vector.load %arg11[%81, %c0_40] : memref<96x128xf32, #tpu.memory_space<vmem>>, vector<8x128xf32>
    %cst_41 = arith.constant dense<0.000000e+00> : vector<8x128xf32>
    %83 = tpu.matmul %49, %10, %cst_41 {dimension_numbers = #tpu.dot_dimension_numbers<[1], [0], [0], [1], [0, 0, 1, 1], [], []>} : vector<8x32xf32>, vector<32x128xf32>, vector<8x128xf32> -> vector<8x128xf32>
    %84 = arith.addf %82, %83 : vector<8x128xf32>
    %85 = vector.extract_strided_slice %84 {offsets = [0, 0], sizes = [8, 96], strides = [1, 1]} : vector<8x128xf32> to vector<8x96xf32>
    %86 = arith.negf %85 : vector<8x96xf32>
    %87 = math.exp %86 : vector<8x96xf32>
    %cst_42 = arith.constant 1.000000e+00 : f32
    %88 = vector.broadcast %cst_42 : f32 to vector<8x96xf32>
    %89 = arith.addf %88, %87 : vector<8x96xf32>
    %90 = arith.divf %88, %89 : vector<8x96xf32>
    %91 = vector.extract_strided_slice %90 {offsets = [0, 0], sizes = [8, 32], strides = [1, 1]} : vector<8x96xf32> to vector<8x32xf32>
    %92 = vector.extract_strided_slice %90 {offsets = [0, 32], sizes = [8, 32], strides = [1, 1]} : vector<8x96xf32> to vector<8x32xf32>
    %93 = vector.extract_strided_slice %90 {offsets = [0, 64], sizes = [8, 32], strides = [1, 1]} : vector<8x96xf32> to vector<8x32xf32>
    %94 = vector.extract_strided_slice %84 {offsets = [0, 96], sizes = [8, 32], strides = [1, 1]} : vector<8x128xf32> to vector<8x32xf32>
    %95 = math.tanh %94 : vector<8x32xf32>
    %96 = arith.mulf %92, %50 : vector<8x32xf32>
    %97 = arith.mulf %91, %95 : vector<8x32xf32>
    %98 = arith.addf %96, %97 : vector<8x32xf32>
    %99 = math.tanh %98 : vector<8x32xf32>
    %100 = arith.mulf %93, %99 : vector<8x32xf32>
    %c8_i32_43 = arith.constant 8 : i32
    %101 = arith.cmpi slt, %78, %c8_i32_43 : i32
    %102 = arith.select %101, %100, %49 : vector<8x32xf32>
    %103 = arith.select %101, %98, %50 : vector<8x32xf32>
    %cst_44 = arith.constant dense<0.000000e+00> : vector<8x128xf32>
    %104 = tpu.matmul %49, %11, %cst_44 {dimension_numbers = #tpu.dot_dimension_numbers<[1], [0], [0], [1], [0, 0, 1, 1], [], []>} : vector<8x32xf32>, vector<32x128xf32>, vector<8x128xf32> -> vector<8x128xf32>
    %cst_45 = arith.constant dense<0.000000e+00> : vector<8x128xf32>
    %105 = tpu.matmul %75, %12, %cst_45 {dimension_numbers = #tpu.dot_dimension_numbers<[1], [0], [0], [1], [0, 0, 1, 1], [], []>} : vector<8x32xf32>, vector<32x128xf32>, vector<8x128xf32> -> vector<8x128xf32>
    %106 = arith.addf %104, %105 : vector<8x128xf32>
    %107 = arith.addf %106, %15 : vector<8x128xf32>
    %108 = vector.extract_strided_slice %107 {offsets = [0, 0], sizes = [8, 96], strides = [1, 1]} : vector<8x128xf32> to vector<8x96xf32>
    %109 = arith.negf %108 : vector<8x96xf32>
    %110 = math.exp %109 : vector<8x96xf32>
    %cst_46 = arith.constant 1.000000e+00 : f32
    %111 = vector.broadcast %cst_46 : f32 to vector<8x96xf32>
    %112 = arith.addf %111, %110 : vector<8x96xf32>
    %113 = arith.divf %111, %112 : vector<8x96xf32>
    %114 = vector.extract_strided_slice %113 {offsets = [0, 0], sizes = [8, 32], strides = [1, 1]} : vector<8x96xf32> to vector<8x32xf32>
    %115 = vector.extract_strided_slice %113 {offsets = [0, 32], sizes = [8, 32], strides = [1, 1]} : vector<8x96xf32> to vector<8x32xf32>
    %116 = vector.extract_strided_slice %113 {offsets = [0, 64], sizes = [8, 32], strides = [1, 1]} : vector<8x96xf32> to vector<8x32xf32>
    %117 = vector.extract_strided_slice %107 {offsets = [0, 96], sizes = [8, 32], strides = [1, 1]} : vector<8x128xf32> to vector<8x32xf32>
    %118 = math.tanh %117 : vector<8x32xf32>
    %119 = arith.mulf %115, %76 : vector<8x32xf32>
    %120 = arith.mulf %114, %118 : vector<8x32xf32>
    %121 = arith.addf %119, %120 : vector<8x32xf32>
    %122 = math.tanh %121 : vector<8x32xf32>
    %123 = arith.mulf %116, %122 : vector<8x32xf32>
    %c1_i32_47 = arith.constant 1 : i32
    %124 = arith.cmpi sge, %78, %c1_i32_47 : i32
    %c1_i32_48 = arith.constant 1 : i32
    %125 = arith.subi %78, %c1_i32_48 : i32
    %c8_i32_49 = arith.constant 8 : i32
    %126 = arith.cmpi slt, %125, %c8_i32_49 : i32
    %127 = arith.andi %124, %126 : i1
    %128 = arith.select %127, %123, %75 : vector<8x32xf32>
    %129 = arith.select %127, %121, %76 : vector<8x32xf32>
    %c2_i32 = arith.constant 2 : i32
    %c12_i32_50 = arith.constant 12 : i32
    %130 = arith.muli %arg0, %c12_i32_50 : i32
    %131 = arith.addi %130, %c2_i32 : i32
    %c8_i32_51 = arith.constant 8 : i32
    %132 = arith.muli %c2_i32, %c8_i32_51 : i32
    %133 = tpu.assume_multiple %132, 8 : i32
    %134 = arith.index_cast %133 : i32 to index
    %c0_52 = arith.constant 0 : index
    %135 = vector.load %arg11[%134, %c0_52] : memref<96x128xf32, #tpu.memory_space<vmem>>, vector<8x128xf32>
    %cst_53 = arith.constant dense<0.000000e+00> : vector<8x128xf32>
    %136 = tpu.matmul %102, %10, %cst_53 {dimension_numbers = #tpu.dot_dimension_numbers<[1], [0], [0], [1], [0, 0, 1, 1], [], []>} : vector<8x32xf32>, vector<32x128xf32>, vector<8x128xf32> -> vector<8x128xf32>
    %137 = arith.addf %135, %136 : vector<8x128xf32>
    %138 = vector.extract_strided_slice %137 {offsets = [0, 0], sizes = [8, 96], strides = [1, 1]} : vector<8x128xf32> to vector<8x96xf32>
    %139 = arith.negf %138 : vector<8x96xf32>
    %140 = math.exp %139 : vector<8x96xf32>
    %cst_54 = arith.constant 1.000000e+00 : f32
    %141 = vector.broadcast %cst_54 : f32 to vector<8x96xf32>
    %142 = arith.addf %141, %140 : vector<8x96xf32>
    %143 = arith.divf %141, %142 : vector<8x96xf32>
    %144 = vector.extract_strided_slice %143 {offsets = [0, 0], sizes = [8, 32], strides = [1, 1]} : vector<8x96xf32> to vector<8x32xf32>
    %145 = vector.extract_strided_slice %143 {offsets = [0, 32], sizes = [8, 32], strides = [1, 1]} : vector<8x96xf32> to vector<8x32xf32>
    %146 = vector.extract_strided_slice %143 {offsets = [0, 64], sizes = [8, 32], strides = [1, 1]} : vector<8x96xf32> to vector<8x32xf32>
    %147 = vector.extract_strided_slice %137 {offsets = [0, 96], sizes = [8, 32], strides = [1, 1]} : vector<8x128xf32> to vector<8x32xf32>
    %148 = math.tanh %147 : vector<8x32xf32>
    %149 = arith.mulf %145, %103 : vector<8x32xf32>
    %150 = arith.mulf %144, %148 : vector<8x32xf32>
    %151 = arith.addf %149, %150 : vector<8x32xf32>
    %152 = math.tanh %151 : vector<8x32xf32>
    %153 = arith.mulf %146, %152 : vector<8x32xf32>
    %c8_i32_55 = arith.constant 8 : i32
    %154 = arith.cmpi slt, %131, %c8_i32_55 : i32
    %155 = arith.select %154, %153, %102 : vector<8x32xf32>
    %156 = arith.select %154, %151, %103 : vector<8x32xf32>
    %cst_56 = arith.constant dense<0.000000e+00> : vector<8x128xf32>
    %157 = tpu.matmul %102, %11, %cst_56 {dimension_numbers = #tpu.dot_dimension_numbers<[1], [0], [0], [1], [0, 0, 1, 1], [], []>} : vector<8x32xf32>, vector<32x128xf32>, vector<8x128xf32> -> vector<8x128xf32>
    %cst_57 = arith.constant dense<0.000000e+00> : vector<8x128xf32>
    %158 = tpu.matmul %128, %12, %cst_57 {dimension_numbers = #tpu.dot_dimension_numbers<[1], [0], [0], [1], [0, 0, 1, 1], [], []>} : vector<8x32xf32>, vector<32x128xf32>, vector<8x128xf32> -> vector<8x128xf32>
    %159 = arith.addf %157, %158 : vector<8x128xf32>
    %160 = arith.addf %159, %15 : vector<8x128xf32>
    %161 = vector.extract_strided_slice %160 {offsets = [0, 0], sizes = [8, 96], strides = [1, 1]} : vector<8x128xf32> to vector<8x96xf32>
    %162 = arith.negf %161 : vector<8x96xf32>
    %163 = math.exp %162 : vector<8x96xf32>
    %cst_58 = arith.constant 1.000000e+00 : f32
    %164 = vector.broadcast %cst_58 : f32 to vector<8x96xf32>
    %165 = arith.addf %164, %163 : vector<8x96xf32>
    %166 = arith.divf %164, %165 : vector<8x96xf32>
    %167 = vector.extract_strided_slice %166 {offsets = [0, 0], sizes = [8, 32], strides = [1, 1]} : vector<8x96xf32> to vector<8x32xf32>
    %168 = vector.extract_strided_slice %166 {offsets = [0, 32], sizes = [8, 32], strides = [1, 1]} : vector<8x96xf32> to vector<8x32xf32>
    %169 = vector.extract_strided_slice %166 {offsets = [0, 64], sizes = [8, 32], strides = [1, 1]} : vector<8x96xf32> to vector<8x32xf32>
    %170 = vector.extract_strided_slice %160 {offsets = [0, 96], sizes = [8, 32], strides = [1, 1]} : vector<8x128xf32> to vector<8x32xf32>
    %171 = math.tanh %170 : vector<8x32xf32>
    %172 = arith.mulf %168, %129 : vector<8x32xf32>
    %173 = arith.mulf %167, %171 : vector<8x32xf32>
    %174 = arith.addf %172, %173 : vector<8x32xf32>
    %175 = math.tanh %174 : vector<8x32xf32>
    %176 = arith.mulf %169, %175 : vector<8x32xf32>
    %c1_i32_59 = arith.constant 1 : i32
    %177 = arith.cmpi sge, %131, %c1_i32_59 : i32
    %c1_i32_60 = arith.constant 1 : i32
    %178 = arith.subi %131, %c1_i32_60 : i32
    %c8_i32_61 = arith.constant 8 : i32
    %179 = arith.cmpi slt, %178, %c8_i32_61 : i32
    %180 = arith.andi %177, %179 : i1
    %181 = arith.select %180, %176, %128 : vector<8x32xf32>
    %182 = arith.select %180, %174, %129 : vector<8x32xf32>
    %c3_i32 = arith.constant 3 : i32
    %c12_i32_62 = arith.constant 12 : i32
    %183 = arith.muli %arg0, %c12_i32_62 : i32
    %184 = arith.addi %183, %c3_i32 : i32
    %c8_i32_63 = arith.constant 8 : i32
    %185 = arith.muli %c3_i32, %c8_i32_63 : i32
    %186 = tpu.assume_multiple %185, 8 : i32
    %187 = arith.index_cast %186 : i32 to index
    %c0_64 = arith.constant 0 : index
    %188 = vector.load %arg11[%187, %c0_64] : memref<96x128xf32, #tpu.memory_space<vmem>>, vector<8x128xf32>
    %cst_65 = arith.constant dense<0.000000e+00> : vector<8x128xf32>
    %189 = tpu.matmul %155, %10, %cst_65 {dimension_numbers = #tpu.dot_dimension_numbers<[1], [0], [0], [1], [0, 0, 1, 1], [], []>} : vector<8x32xf32>, vector<32x128xf32>, vector<8x128xf32> -> vector<8x128xf32>
    %190 = arith.addf %188, %189 : vector<8x128xf32>
    %191 = vector.extract_strided_slice %190 {offsets = [0, 0], sizes = [8, 96], strides = [1, 1]} : vector<8x128xf32> to vector<8x96xf32>
    %192 = arith.negf %191 : vector<8x96xf32>
    %193 = math.exp %192 : vector<8x96xf32>
    %cst_66 = arith.constant 1.000000e+00 : f32
    %194 = vector.broadcast %cst_66 : f32 to vector<8x96xf32>
    %195 = arith.addf %194, %193 : vector<8x96xf32>
    %196 = arith.divf %194, %195 : vector<8x96xf32>
    %197 = vector.extract_strided_slice %196 {offsets = [0, 0], sizes = [8, 32], strides = [1, 1]} : vector<8x96xf32> to vector<8x32xf32>
    %198 = vector.extract_strided_slice %196 {offsets = [0, 32], sizes = [8, 32], strides = [1, 1]} : vector<8x96xf32> to vector<8x32xf32>
    %199 = vector.extract_strided_slice %196 {offsets = [0, 64], sizes = [8, 32], strides = [1, 1]} : vector<8x96xf32> to vector<8x32xf32>
    %200 = vector.extract_strided_slice %190 {offsets = [0, 96], sizes = [8, 32], strides = [1, 1]} : vector<8x128xf32> to vector<8x32xf32>
    %201 = math.tanh %200 : vector<8x32xf32>
    %202 = arith.mulf %198, %156 : vector<8x32xf32>
    %203 = arith.mulf %197, %201 : vector<8x32xf32>
    %204 = arith.addf %202, %203 : vector<8x32xf32>
    %205 = math.tanh %204 : vector<8x32xf32>
    %206 = arith.mulf %199, %205 : vector<8x32xf32>
    %c8_i32_67 = arith.constant 8 : i32
    %207 = arith.cmpi slt, %184, %c8_i32_67 : i32
    %208 = arith.select %207, %206, %155 : vector<8x32xf32>
    %209 = arith.select %207, %204, %156 : vector<8x32xf32>
    %cst_68 = arith.constant dense<0.000000e+00> : vector<8x128xf32>
    %210 = tpu.matmul %155, %11, %cst_68 {dimension_numbers = #tpu.dot_dimension_numbers<[1], [0], [0], [1], [0, 0, 1, 1], [], []>} : vector<8x32xf32>, vector<32x128xf32>, vector<8x128xf32> -> vector<8x128xf32>
    %cst_69 = arith.constant dense<0.000000e+00> : vector<8x128xf32>
    %211 = tpu.matmul %181, %12, %cst_69 {dimension_numbers = #tpu.dot_dimension_numbers<[1], [0], [0], [1], [0, 0, 1, 1], [], []>} : vector<8x32xf32>, vector<32x128xf32>, vector<8x128xf32> -> vector<8x128xf32>
    %212 = arith.addf %210, %211 : vector<8x128xf32>
    %213 = arith.addf %212, %15 : vector<8x128xf32>
    %214 = vector.extract_strided_slice %213 {offsets = [0, 0], sizes = [8, 96], strides = [1, 1]} : vector<8x128xf32> to vector<8x96xf32>
    %215 = arith.negf %214 : vector<8x96xf32>
    %216 = math.exp %215 : vector<8x96xf32>
    %cst_70 = arith.constant 1.000000e+00 : f32
    %217 = vector.broadcast %cst_70 : f32 to vector<8x96xf32>
    %218 = arith.addf %217, %216 : vector<8x96xf32>
    %219 = arith.divf %217, %218 : vector<8x96xf32>
    %220 = vector.extract_strided_slice %219 {offsets = [0, 0], sizes = [8, 32], strides = [1, 1]} : vector<8x96xf32> to vector<8x32xf32>
    %221 = vector.extract_strided_slice %219 {offsets = [0, 32], sizes = [8, 32], strides = [1, 1]} : vector<8x96xf32> to vector<8x32xf32>
    %222 = vector.extract_strided_slice %219 {offsets = [0, 64], sizes = [8, 32], strides = [1, 1]} : vector<8x96xf32> to vector<8x32xf32>
    %223 = vector.extract_strided_slice %213 {offsets = [0, 96], sizes = [8, 32], strides = [1, 1]} : vector<8x128xf32> to vector<8x32xf32>
    %224 = math.tanh %223 : vector<8x32xf32>
    %225 = arith.mulf %221, %182 : vector<8x32xf32>
    %226 = arith.mulf %220, %224 : vector<8x32xf32>
    %227 = arith.addf %225, %226 : vector<8x32xf32>
    %228 = math.tanh %227 : vector<8x32xf32>
    %229 = arith.mulf %222, %228 : vector<8x32xf32>
    %c1_i32_71 = arith.constant 1 : i32
    %230 = arith.cmpi sge, %184, %c1_i32_71 : i32
    %c1_i32_72 = arith.constant 1 : i32
    %231 = arith.subi %184, %c1_i32_72 : i32
    %c8_i32_73 = arith.constant 8 : i32
    %232 = arith.cmpi slt, %231, %c8_i32_73 : i32
    %233 = arith.andi %230, %232 : i1
    %234 = arith.select %233, %229, %181 : vector<8x32xf32>
    %235 = arith.select %233, %227, %182 : vector<8x32xf32>
    %c4_i32 = arith.constant 4 : i32
    %c12_i32_74 = arith.constant 12 : i32
    %236 = arith.muli %arg0, %c12_i32_74 : i32
    %237 = arith.addi %236, %c4_i32 : i32
    %c8_i32_75 = arith.constant 8 : i32
    %238 = arith.muli %c4_i32, %c8_i32_75 : i32
    %239 = tpu.assume_multiple %238, 8 : i32
    %240 = arith.index_cast %239 : i32 to index
    %c0_76 = arith.constant 0 : index
    %241 = vector.load %arg11[%240, %c0_76] : memref<96x128xf32, #tpu.memory_space<vmem>>, vector<8x128xf32>
    %cst_77 = arith.constant dense<0.000000e+00> : vector<8x128xf32>
    %242 = tpu.matmul %208, %10, %cst_77 {dimension_numbers = #tpu.dot_dimension_numbers<[1], [0], [0], [1], [0, 0, 1, 1], [], []>} : vector<8x32xf32>, vector<32x128xf32>, vector<8x128xf32> -> vector<8x128xf32>
    %243 = arith.addf %241, %242 : vector<8x128xf32>
    %244 = vector.extract_strided_slice %243 {offsets = [0, 0], sizes = [8, 96], strides = [1, 1]} : vector<8x128xf32> to vector<8x96xf32>
    %245 = arith.negf %244 : vector<8x96xf32>
    %246 = math.exp %245 : vector<8x96xf32>
    %cst_78 = arith.constant 1.000000e+00 : f32
    %247 = vector.broadcast %cst_78 : f32 to vector<8x96xf32>
    %248 = arith.addf %247, %246 : vector<8x96xf32>
    %249 = arith.divf %247, %248 : vector<8x96xf32>
    %250 = vector.extract_strided_slice %249 {offsets = [0, 0], sizes = [8, 32], strides = [1, 1]} : vector<8x96xf32> to vector<8x32xf32>
    %251 = vector.extract_strided_slice %249 {offsets = [0, 32], sizes = [8, 32], strides = [1, 1]} : vector<8x96xf32> to vector<8x32xf32>
    %252 = vector.extract_strided_slice %249 {offsets = [0, 64], sizes = [8, 32], strides = [1, 1]} : vector<8x96xf32> to vector<8x32xf32>
    %253 = vector.extract_strided_slice %243 {offsets = [0, 96], sizes = [8, 32], strides = [1, 1]} : vector<8x128xf32> to vector<8x32xf32>
    %254 = math.tanh %253 : vector<8x32xf32>
    %255 = arith.mulf %251, %209 : vector<8x32xf32>
    %256 = arith.mulf %250, %254 : vector<8x32xf32>
    %257 = arith.addf %255, %256 : vector<8x32xf32>
    %258 = math.tanh %257 : vector<8x32xf32>
    %259 = arith.mulf %252, %258 : vector<8x32xf32>
    %c8_i32_79 = arith.constant 8 : i32
    %260 = arith.cmpi slt, %237, %c8_i32_79 : i32
    %261 = arith.select %260, %259, %208 : vector<8x32xf32>
    %262 = arith.select %260, %257, %209 : vector<8x32xf32>
    %cst_80 = arith.constant dense<0.000000e+00> : vector<8x128xf32>
    %263 = tpu.matmul %208, %11, %cst_80 {dimension_numbers = #tpu.dot_dimension_numbers<[1], [0], [0], [1], [0, 0, 1, 1], [], []>} : vector<8x32xf32>, vector<32x128xf32>, vector<8x128xf32> -> vector<8x128xf32>
    %cst_81 = arith.constant dense<0.000000e+00> : vector<8x128xf32>
    %264 = tpu.matmul %234, %12, %cst_81 {dimension_numbers = #tpu.dot_dimension_numbers<[1], [0], [0], [1], [0, 0, 1, 1], [], []>} : vector<8x32xf32>, vector<32x128xf32>, vector<8x128xf32> -> vector<8x128xf32>
    %265 = arith.addf %263, %264 : vector<8x128xf32>
    %266 = arith.addf %265, %15 : vector<8x128xf32>
    %267 = vector.extract_strided_slice %266 {offsets = [0, 0], sizes = [8, 96], strides = [1, 1]} : vector<8x128xf32> to vector<8x96xf32>
    %268 = arith.negf %267 : vector<8x96xf32>
    %269 = math.exp %268 : vector<8x96xf32>
    %cst_82 = arith.constant 1.000000e+00 : f32
    %270 = vector.broadcast %cst_82 : f32 to vector<8x96xf32>
    %271 = arith.addf %270, %269 : vector<8x96xf32>
    %272 = arith.divf %270, %271 : vector<8x96xf32>
    %273 = vector.extract_strided_slice %272 {offsets = [0, 0], sizes = [8, 32], strides = [1, 1]} : vector<8x96xf32> to vector<8x32xf32>
    %274 = vector.extract_strided_slice %272 {offsets = [0, 32], sizes = [8, 32], strides = [1, 1]} : vector<8x96xf32> to vector<8x32xf32>
    %275 = vector.extract_strided_slice %272 {offsets = [0, 64], sizes = [8, 32], strides = [1, 1]} : vector<8x96xf32> to vector<8x32xf32>
    %276 = vector.extract_strided_slice %266 {offsets = [0, 96], sizes = [8, 32], strides = [1, 1]} : vector<8x128xf32> to vector<8x32xf32>
    %277 = math.tanh %276 : vector<8x32xf32>
    %278 = arith.mulf %274, %235 : vector<8x32xf32>
    %279 = arith.mulf %273, %277 : vector<8x32xf32>
    %280 = arith.addf %278, %279 : vector<8x32xf32>
    %281 = math.tanh %280 : vector<8x32xf32>
    %282 = arith.mulf %275, %281 : vector<8x32xf32>
    %c1_i32_83 = arith.constant 1 : i32
    %283 = arith.cmpi sge, %237, %c1_i32_83 : i32
    %c1_i32_84 = arith.constant 1 : i32
    %284 = arith.subi %237, %c1_i32_84 : i32
    %c8_i32_85 = arith.constant 8 : i32
    %285 = arith.cmpi slt, %284, %c8_i32_85 : i32
    %286 = arith.andi %283, %285 : i1
    %287 = arith.select %286, %282, %234 : vector<8x32xf32>
    %288 = arith.select %286, %280, %235 : vector<8x32xf32>
    %c5_i32 = arith.constant 5 : i32
    %c12_i32_86 = arith.constant 12 : i32
    %289 = arith.muli %arg0, %c12_i32_86 : i32
    %290 = arith.addi %289, %c5_i32 : i32
    %c8_i32_87 = arith.constant 8 : i32
    %291 = arith.muli %c5_i32, %c8_i32_87 : i32
    %292 = tpu.assume_multiple %291, 8 : i32
    %293 = arith.index_cast %292 : i32 to index
    %c0_88 = arith.constant 0 : index
    %294 = vector.load %arg11[%293, %c0_88] : memref<96x128xf32, #tpu.memory_space<vmem>>, vector<8x128xf32>
    %cst_89 = arith.constant dense<0.000000e+00> : vector<8x128xf32>
    %295 = tpu.matmul %261, %10, %cst_89 {dimension_numbers = #tpu.dot_dimension_numbers<[1], [0], [0], [1], [0, 0, 1, 1], [], []>} : vector<8x32xf32>, vector<32x128xf32>, vector<8x128xf32> -> vector<8x128xf32>
    %296 = arith.addf %294, %295 : vector<8x128xf32>
    %297 = vector.extract_strided_slice %296 {offsets = [0, 0], sizes = [8, 96], strides = [1, 1]} : vector<8x128xf32> to vector<8x96xf32>
    %298 = arith.negf %297 : vector<8x96xf32>
    %299 = math.exp %298 : vector<8x96xf32>
    %cst_90 = arith.constant 1.000000e+00 : f32
    %300 = vector.broadcast %cst_90 : f32 to vector<8x96xf32>
    %301 = arith.addf %300, %299 : vector<8x96xf32>
    %302 = arith.divf %300, %301 : vector<8x96xf32>
    %303 = vector.extract_strided_slice %302 {offsets = [0, 0], sizes = [8, 32], strides = [1, 1]} : vector<8x96xf32> to vector<8x32xf32>
    %304 = vector.extract_strided_slice %302 {offsets = [0, 32], sizes = [8, 32], strides = [1, 1]} : vector<8x96xf32> to vector<8x32xf32>
    %305 = vector.extract_strided_slice %302 {offsets = [0, 64], sizes = [8, 32], strides = [1, 1]} : vector<8x96xf32> to vector<8x32xf32>
    %306 = vector.extract_strided_slice %296 {offsets = [0, 96], sizes = [8, 32], strides = [1, 1]} : vector<8x128xf32> to vector<8x32xf32>
    %307 = math.tanh %306 : vector<8x32xf32>
    %308 = arith.mulf %304, %262 : vector<8x32xf32>
    %309 = arith.mulf %303, %307 : vector<8x32xf32>
    %310 = arith.addf %308, %309 : vector<8x32xf32>
    %311 = math.tanh %310 : vector<8x32xf32>
    %312 = arith.mulf %305, %311 : vector<8x32xf32>
    %c8_i32_91 = arith.constant 8 : i32
    %313 = arith.cmpi slt, %290, %c8_i32_91 : i32
    %314 = arith.select %313, %312, %261 : vector<8x32xf32>
    %315 = arith.select %313, %310, %262 : vector<8x32xf32>
    %cst_92 = arith.constant dense<0.000000e+00> : vector<8x128xf32>
    %316 = tpu.matmul %261, %11, %cst_92 {dimension_numbers = #tpu.dot_dimension_numbers<[1], [0], [0], [1], [0, 0, 1, 1], [], []>} : vector<8x32xf32>, vector<32x128xf32>, vector<8x128xf32> -> vector<8x128xf32>
    %cst_93 = arith.constant dense<0.000000e+00> : vector<8x128xf32>
    %317 = tpu.matmul %287, %12, %cst_93 {dimension_numbers = #tpu.dot_dimension_numbers<[1], [0], [0], [1], [0, 0, 1, 1], [], []>} : vector<8x32xf32>, vector<32x128xf32>, vector<8x128xf32> -> vector<8x128xf32>
    %318 = arith.addf %316, %317 : vector<8x128xf32>
    %319 = arith.addf %318, %15 : vector<8x128xf32>
    %320 = vector.extract_strided_slice %319 {offsets = [0, 0], sizes = [8, 96], strides = [1, 1]} : vector<8x128xf32> to vector<8x96xf32>
    %321 = arith.negf %320 : vector<8x96xf32>
    %322 = math.exp %321 : vector<8x96xf32>
    %cst_94 = arith.constant 1.000000e+00 : f32
    %323 = vector.broadcast %cst_94 : f32 to vector<8x96xf32>
    %324 = arith.addf %323, %322 : vector<8x96xf32>
    %325 = arith.divf %323, %324 : vector<8x96xf32>
    %326 = vector.extract_strided_slice %325 {offsets = [0, 0], sizes = [8, 32], strides = [1, 1]} : vector<8x96xf32> to vector<8x32xf32>
    %327 = vector.extract_strided_slice %325 {offsets = [0, 32], sizes = [8, 32], strides = [1, 1]} : vector<8x96xf32> to vector<8x32xf32>
    %328 = vector.extract_strided_slice %325 {offsets = [0, 64], sizes = [8, 32], strides = [1, 1]} : vector<8x96xf32> to vector<8x32xf32>
    %329 = vector.extract_strided_slice %319 {offsets = [0, 96], sizes = [8, 32], strides = [1, 1]} : vector<8x128xf32> to vector<8x32xf32>
    %330 = math.tanh %329 : vector<8x32xf32>
    %331 = arith.mulf %327, %288 : vector<8x32xf32>
    %332 = arith.mulf %326, %330 : vector<8x32xf32>
    %333 = arith.addf %331, %332 : vector<8x32xf32>
    %334 = math.tanh %333 : vector<8x32xf32>
    %335 = arith.mulf %328, %334 : vector<8x32xf32>
    %c1_i32_95 = arith.constant 1 : i32
    %336 = arith.cmpi sge, %290, %c1_i32_95 : i32
    %c1_i32_96 = arith.constant 1 : i32
    %337 = arith.subi %290, %c1_i32_96 : i32
    %c8_i32_97 = arith.constant 8 : i32
    %338 = arith.cmpi slt, %337, %c8_i32_97 : i32
    %339 = arith.andi %336, %338 : i1
    %340 = arith.select %339, %335, %287 : vector<8x32xf32>
    %341 = arith.select %339, %333, %288 : vector<8x32xf32>
    %c6_i32 = arith.constant 6 : i32
    %c12_i32_98 = arith.constant 12 : i32
    %342 = arith.muli %arg0, %c12_i32_98 : i32
    %343 = arith.addi %342, %c6_i32 : i32
    %c8_i32_99 = arith.constant 8 : i32
    %344 = arith.muli %c6_i32, %c8_i32_99 : i32
    %345 = tpu.assume_multiple %344, 8 : i32
    %346 = arith.index_cast %345 : i32 to index
    %c0_100 = arith.constant 0 : index
    %347 = vector.load %arg11[%346, %c0_100] : memref<96x128xf32, #tpu.memory_space<vmem>>, vector<8x128xf32>
    %cst_101 = arith.constant dense<0.000000e+00> : vector<8x128xf32>
    %348 = tpu.matmul %314, %10, %cst_101 {dimension_numbers = #tpu.dot_dimension_numbers<[1], [0], [0], [1], [0, 0, 1, 1], [], []>} : vector<8x32xf32>, vector<32x128xf32>, vector<8x128xf32> -> vector<8x128xf32>
    %349 = arith.addf %347, %348 : vector<8x128xf32>
    %350 = vector.extract_strided_slice %349 {offsets = [0, 0], sizes = [8, 96], strides = [1, 1]} : vector<8x128xf32> to vector<8x96xf32>
    %351 = arith.negf %350 : vector<8x96xf32>
    %352 = math.exp %351 : vector<8x96xf32>
    %cst_102 = arith.constant 1.000000e+00 : f32
    %353 = vector.broadcast %cst_102 : f32 to vector<8x96xf32>
    %354 = arith.addf %353, %352 : vector<8x96xf32>
    %355 = arith.divf %353, %354 : vector<8x96xf32>
    %356 = vector.extract_strided_slice %355 {offsets = [0, 0], sizes = [8, 32], strides = [1, 1]} : vector<8x96xf32> to vector<8x32xf32>
    %357 = vector.extract_strided_slice %355 {offsets = [0, 32], sizes = [8, 32], strides = [1, 1]} : vector<8x96xf32> to vector<8x32xf32>
    %358 = vector.extract_strided_slice %355 {offsets = [0, 64], sizes = [8, 32], strides = [1, 1]} : vector<8x96xf32> to vector<8x32xf32>
    %359 = vector.extract_strided_slice %349 {offsets = [0, 96], sizes = [8, 32], strides = [1, 1]} : vector<8x128xf32> to vector<8x32xf32>
    %360 = math.tanh %359 : vector<8x32xf32>
    %361 = arith.mulf %357, %315 : vector<8x32xf32>
    %362 = arith.mulf %356, %360 : vector<8x32xf32>
    %363 = arith.addf %361, %362 : vector<8x32xf32>
    %364 = math.tanh %363 : vector<8x32xf32>
    %365 = arith.mulf %358, %364 : vector<8x32xf32>
    %c8_i32_103 = arith.constant 8 : i32
    %366 = arith.cmpi slt, %343, %c8_i32_103 : i32
    %367 = arith.select %366, %365, %314 : vector<8x32xf32>
    %368 = arith.select %366, %363, %315 : vector<8x32xf32>
    %cst_104 = arith.constant dense<0.000000e+00> : vector<8x128xf32>
    %369 = tpu.matmul %314, %11, %cst_104 {dimension_numbers = #tpu.dot_dimension_numbers<[1], [0], [0], [1], [0, 0, 1, 1], [], []>} : vector<8x32xf32>, vector<32x128xf32>, vector<8x128xf32> -> vector<8x128xf32>
    %cst_105 = arith.constant dense<0.000000e+00> : vector<8x128xf32>
    %370 = tpu.matmul %340, %12, %cst_105 {dimension_numbers = #tpu.dot_dimension_numbers<[1], [0], [0], [1], [0, 0, 1, 1], [], []>} : vector<8x32xf32>, vector<32x128xf32>, vector<8x128xf32> -> vector<8x128xf32>
    %371 = arith.addf %369, %370 : vector<8x128xf32>
    %372 = arith.addf %371, %15 : vector<8x128xf32>
    %373 = vector.extract_strided_slice %372 {offsets = [0, 0], sizes = [8, 96], strides = [1, 1]} : vector<8x128xf32> to vector<8x96xf32>
    %374 = arith.negf %373 : vector<8x96xf32>
    %375 = math.exp %374 : vector<8x96xf32>
    %cst_106 = arith.constant 1.000000e+00 : f32
    %376 = vector.broadcast %cst_106 : f32 to vector<8x96xf32>
    %377 = arith.addf %376, %375 : vector<8x96xf32>
    %378 = arith.divf %376, %377 : vector<8x96xf32>
    %379 = vector.extract_strided_slice %378 {offsets = [0, 0], sizes = [8, 32], strides = [1, 1]} : vector<8x96xf32> to vector<8x32xf32>
    %380 = vector.extract_strided_slice %378 {offsets = [0, 32], sizes = [8, 32], strides = [1, 1]} : vector<8x96xf32> to vector<8x32xf32>
    %381 = vector.extract_strided_slice %378 {offsets = [0, 64], sizes = [8, 32], strides = [1, 1]} : vector<8x96xf32> to vector<8x32xf32>
    %382 = vector.extract_strided_slice %372 {offsets = [0, 96], sizes = [8, 32], strides = [1, 1]} : vector<8x128xf32> to vector<8x32xf32>
    %383 = math.tanh %382 : vector<8x32xf32>
    %384 = arith.mulf %380, %341 : vector<8x32xf32>
    %385 = arith.mulf %379, %383 : vector<8x32xf32>
    %386 = arith.addf %384, %385 : vector<8x32xf32>
    %387 = math.tanh %386 : vector<8x32xf32>
    %388 = arith.mulf %381, %387 : vector<8x32xf32>
    %c1_i32_107 = arith.constant 1 : i32
    %389 = arith.cmpi sge, %343, %c1_i32_107 : i32
    %c1_i32_108 = arith.constant 1 : i32
    %390 = arith.subi %343, %c1_i32_108 : i32
    %c8_i32_109 = arith.constant 8 : i32
    %391 = arith.cmpi slt, %390, %c8_i32_109 : i32
    %392 = arith.andi %389, %391 : i1
    %393 = arith.select %392, %388, %340 : vector<8x32xf32>
    %394 = arith.select %392, %386, %341 : vector<8x32xf32>
    %c7_i32 = arith.constant 7 : i32
    %c12_i32_110 = arith.constant 12 : i32
    %395 = arith.muli %arg0, %c12_i32_110 : i32
    %396 = arith.addi %395, %c7_i32 : i32
    %c8_i32_111 = arith.constant 8 : i32
    %397 = arith.muli %c7_i32, %c8_i32_111 : i32
    %398 = tpu.assume_multiple %397, 8 : i32
    %399 = arith.index_cast %398 : i32 to index
    %c0_112 = arith.constant 0 : index
    %400 = vector.load %arg11[%399, %c0_112] : memref<96x128xf32, #tpu.memory_space<vmem>>, vector<8x128xf32>
    %cst_113 = arith.constant dense<0.000000e+00> : vector<8x128xf32>
    %401 = tpu.matmul %367, %10, %cst_113 {dimension_numbers = #tpu.dot_dimension_numbers<[1], [0], [0], [1], [0, 0, 1, 1], [], []>} : vector<8x32xf32>, vector<32x128xf32>, vector<8x128xf32> -> vector<8x128xf32>
    %402 = arith.addf %400, %401 : vector<8x128xf32>
    %403 = vector.extract_strided_slice %402 {offsets = [0, 0], sizes = [8, 96], strides = [1, 1]} : vector<8x128xf32> to vector<8x96xf32>
    %404 = arith.negf %403 : vector<8x96xf32>
    %405 = math.exp %404 : vector<8x96xf32>
    %cst_114 = arith.constant 1.000000e+00 : f32
    %406 = vector.broadcast %cst_114 : f32 to vector<8x96xf32>
    %407 = arith.addf %406, %405 : vector<8x96xf32>
    %408 = arith.divf %406, %407 : vector<8x96xf32>
    %409 = vector.extract_strided_slice %408 {offsets = [0, 0], sizes = [8, 32], strides = [1, 1]} : vector<8x96xf32> to vector<8x32xf32>
    %410 = vector.extract_strided_slice %408 {offsets = [0, 32], sizes = [8, 32], strides = [1, 1]} : vector<8x96xf32> to vector<8x32xf32>
    %411 = vector.extract_strided_slice %408 {offsets = [0, 64], sizes = [8, 32], strides = [1, 1]} : vector<8x96xf32> to vector<8x32xf32>
    %412 = vector.extract_strided_slice %402 {offsets = [0, 96], sizes = [8, 32], strides = [1, 1]} : vector<8x128xf32> to vector<8x32xf32>
    %413 = math.tanh %412 : vector<8x32xf32>
    %414 = arith.mulf %410, %368 : vector<8x32xf32>
    %415 = arith.mulf %409, %413 : vector<8x32xf32>
    %416 = arith.addf %414, %415 : vector<8x32xf32>
    %417 = math.tanh %416 : vector<8x32xf32>
    %418 = arith.mulf %411, %417 : vector<8x32xf32>
    %c8_i32_115 = arith.constant 8 : i32
    %419 = arith.cmpi slt, %396, %c8_i32_115 : i32
    %420 = arith.select %419, %418, %367 : vector<8x32xf32>
    %421 = arith.select %419, %416, %368 : vector<8x32xf32>
    %cst_116 = arith.constant dense<0.000000e+00> : vector<8x128xf32>
    %422 = tpu.matmul %367, %11, %cst_116 {dimension_numbers = #tpu.dot_dimension_numbers<[1], [0], [0], [1], [0, 0, 1, 1], [], []>} : vector<8x32xf32>, vector<32x128xf32>, vector<8x128xf32> -> vector<8x128xf32>
    %cst_117 = arith.constant dense<0.000000e+00> : vector<8x128xf32>
    %423 = tpu.matmul %393, %12, %cst_117 {dimension_numbers = #tpu.dot_dimension_numbers<[1], [0], [0], [1], [0, 0, 1, 1], [], []>} : vector<8x32xf32>, vector<32x128xf32>, vector<8x128xf32> -> vector<8x128xf32>
    %424 = arith.addf %422, %423 : vector<8x128xf32>
    %425 = arith.addf %424, %15 : vector<8x128xf32>
    %426 = vector.extract_strided_slice %425 {offsets = [0, 0], sizes = [8, 96], strides = [1, 1]} : vector<8x128xf32> to vector<8x96xf32>
    %427 = arith.negf %426 : vector<8x96xf32>
    %428 = math.exp %427 : vector<8x96xf32>
    %cst_118 = arith.constant 1.000000e+00 : f32
    %429 = vector.broadcast %cst_118 : f32 to vector<8x96xf32>
    %430 = arith.addf %429, %428 : vector<8x96xf32>
    %431 = arith.divf %429, %430 : vector<8x96xf32>
    %432 = vector.extract_strided_slice %431 {offsets = [0, 0], sizes = [8, 32], strides = [1, 1]} : vector<8x96xf32> to vector<8x32xf32>
    %433 = vector.extract_strided_slice %431 {offsets = [0, 32], sizes = [8, 32], strides = [1, 1]} : vector<8x96xf32> to vector<8x32xf32>
    %434 = vector.extract_strided_slice %431 {offsets = [0, 64], sizes = [8, 32], strides = [1, 1]} : vector<8x96xf32> to vector<8x32xf32>
    %435 = vector.extract_strided_slice %425 {offsets = [0, 96], sizes = [8, 32], strides = [1, 1]} : vector<8x128xf32> to vector<8x32xf32>
    %436 = math.tanh %435 : vector<8x32xf32>
    %437 = arith.mulf %433, %394 : vector<8x32xf32>
    %438 = arith.mulf %432, %436 : vector<8x32xf32>
    %439 = arith.addf %437, %438 : vector<8x32xf32>
    %440 = math.tanh %439 : vector<8x32xf32>
    %441 = arith.mulf %434, %440 : vector<8x32xf32>
    %c1_i32_119 = arith.constant 1 : i32
    %442 = arith.cmpi sge, %396, %c1_i32_119 : i32
    %c1_i32_120 = arith.constant 1 : i32
    %443 = arith.subi %396, %c1_i32_120 : i32
    %c8_i32_121 = arith.constant 8 : i32
    %444 = arith.cmpi slt, %443, %c8_i32_121 : i32
    %445 = arith.andi %442, %444 : i1
    %446 = arith.select %445, %441, %393 : vector<8x32xf32>
    %447 = arith.select %445, %439, %394 : vector<8x32xf32>
    %c8_i32_122 = arith.constant 8 : i32
    %c12_i32_123 = arith.constant 12 : i32
    %448 = arith.muli %arg0, %c12_i32_123 : i32
    %449 = arith.addi %448, %c8_i32_122 : i32
    %c8_i32_124 = arith.constant 8 : i32
    %450 = arith.muli %c8_i32_122, %c8_i32_124 : i32
    %451 = tpu.assume_multiple %450, 8 : i32
    %452 = arith.index_cast %451 : i32 to index
    %c0_125 = arith.constant 0 : index
    %453 = vector.load %arg11[%452, %c0_125] : memref<96x128xf32, #tpu.memory_space<vmem>>, vector<8x128xf32>
    %cst_126 = arith.constant dense<0.000000e+00> : vector<8x128xf32>
    %454 = tpu.matmul %420, %10, %cst_126 {dimension_numbers = #tpu.dot_dimension_numbers<[1], [0], [0], [1], [0, 0, 1, 1], [], []>} : vector<8x32xf32>, vector<32x128xf32>, vector<8x128xf32> -> vector<8x128xf32>
    %455 = arith.addf %453, %454 : vector<8x128xf32>
    %456 = vector.extract_strided_slice %455 {offsets = [0, 0], sizes = [8, 96], strides = [1, 1]} : vector<8x128xf32> to vector<8x96xf32>
    %457 = arith.negf %456 : vector<8x96xf32>
    %458 = math.exp %457 : vector<8x96xf32>
    %cst_127 = arith.constant 1.000000e+00 : f32
    %459 = vector.broadcast %cst_127 : f32 to vector<8x96xf32>
    %460 = arith.addf %459, %458 : vector<8x96xf32>
    %461 = arith.divf %459, %460 : vector<8x96xf32>
    %462 = vector.extract_strided_slice %461 {offsets = [0, 0], sizes = [8, 32], strides = [1, 1]} : vector<8x96xf32> to vector<8x32xf32>
    %463 = vector.extract_strided_slice %461 {offsets = [0, 32], sizes = [8, 32], strides = [1, 1]} : vector<8x96xf32> to vector<8x32xf32>
    %464 = vector.extract_strided_slice %461 {offsets = [0, 64], sizes = [8, 32], strides = [1, 1]} : vector<8x96xf32> to vector<8x32xf32>
    %465 = vector.extract_strided_slice %455 {offsets = [0, 96], sizes = [8, 32], strides = [1, 1]} : vector<8x128xf32> to vector<8x32xf32>
    %466 = math.tanh %465 : vector<8x32xf32>
    %467 = arith.mulf %463, %421 : vector<8x32xf32>
    %468 = arith.mulf %462, %466 : vector<8x32xf32>
    %469 = arith.addf %467, %468 : vector<8x32xf32>
    %470 = math.tanh %469 : vector<8x32xf32>
    %471 = arith.mulf %464, %470 : vector<8x32xf32>
    %c8_i32_128 = arith.constant 8 : i32
    %472 = arith.cmpi slt, %449, %c8_i32_128 : i32
    %473 = arith.select %472, %471, %420 : vector<8x32xf32>
    %474 = arith.select %472, %469, %421 : vector<8x32xf32>
    %cst_129 = arith.constant dense<0.000000e+00> : vector<8x128xf32>
    %475 = tpu.matmul %420, %11, %cst_129 {dimension_numbers = #tpu.dot_dimension_numbers<[1], [0], [0], [1], [0, 0, 1, 1], [], []>} : vector<8x32xf32>, vector<32x128xf32>, vector<8x128xf32> -> vector<8x128xf32>
    %cst_130 = arith.constant dense<0.000000e+00> : vector<8x128xf32>
    %476 = tpu.matmul %446, %12, %cst_130 {dimension_numbers = #tpu.dot_dimension_numbers<[1], [0], [0], [1], [0, 0, 1, 1], [], []>} : vector<8x32xf32>, vector<32x128xf32>, vector<8x128xf32> -> vector<8x128xf32>
    %477 = arith.addf %475, %476 : vector<8x128xf32>
    %478 = arith.addf %477, %15 : vector<8x128xf32>
    %479 = vector.extract_strided_slice %478 {offsets = [0, 0], sizes = [8, 96], strides = [1, 1]} : vector<8x128xf32> to vector<8x96xf32>
    %480 = arith.negf %479 : vector<8x96xf32>
    %481 = math.exp %480 : vector<8x96xf32>
    %cst_131 = arith.constant 1.000000e+00 : f32
    %482 = vector.broadcast %cst_131 : f32 to vector<8x96xf32>
    %483 = arith.addf %482, %481 : vector<8x96xf32>
    %484 = arith.divf %482, %483 : vector<8x96xf32>
    %485 = vector.extract_strided_slice %484 {offsets = [0, 0], sizes = [8, 32], strides = [1, 1]} : vector<8x96xf32> to vector<8x32xf32>
    %486 = vector.extract_strided_slice %484 {offsets = [0, 32], sizes = [8, 32], strides = [1, 1]} : vector<8x96xf32> to vector<8x32xf32>
    %487 = vector.extract_strided_slice %484 {offsets = [0, 64], sizes = [8, 32], strides = [1, 1]} : vector<8x96xf32> to vector<8x32xf32>
    %488 = vector.extract_strided_slice %478 {offsets = [0, 96], sizes = [8, 32], strides = [1, 1]} : vector<8x128xf32> to vector<8x32xf32>
    %489 = math.tanh %488 : vector<8x32xf32>
    %490 = arith.mulf %486, %447 : vector<8x32xf32>
    %491 = arith.mulf %485, %489 : vector<8x32xf32>
    %492 = arith.addf %490, %491 : vector<8x32xf32>
    %493 = math.tanh %492 : vector<8x32xf32>
    %494 = arith.mulf %487, %493 : vector<8x32xf32>
    %c1_i32_132 = arith.constant 1 : i32
    %495 = arith.cmpi sge, %449, %c1_i32_132 : i32
    %c1_i32_133 = arith.constant 1 : i32
    %496 = arith.subi %449, %c1_i32_133 : i32
    %c8_i32_134 = arith.constant 8 : i32
    %497 = arith.cmpi slt, %496, %c8_i32_134 : i32
    %498 = arith.andi %495, %497 : i1
    %499 = arith.select %498, %494, %446 : vector<8x32xf32>
    %500 = arith.select %498, %492, %447 : vector<8x32xf32>
    %c9_i32 = arith.constant 9 : i32
    %c12_i32_135 = arith.constant 12 : i32
    %501 = arith.muli %arg0, %c12_i32_135 : i32
    %502 = arith.addi %501, %c9_i32 : i32
    %c8_i32_136 = arith.constant 8 : i32
    %503 = arith.muli %c9_i32, %c8_i32_136 : i32
    %504 = tpu.assume_multiple %503, 8 : i32
    %505 = arith.index_cast %504 : i32 to index
    %c0_137 = arith.constant 0 : index
    %506 = vector.load %arg11[%505, %c0_137] : memref<96x128xf32, #tpu.memory_space<vmem>>, vector<8x128xf32>
    %cst_138 = arith.constant dense<0.000000e+00> : vector<8x128xf32>
    %507 = tpu.matmul %473, %10, %cst_138 {dimension_numbers = #tpu.dot_dimension_numbers<[1], [0], [0], [1], [0, 0, 1, 1], [], []>} : vector<8x32xf32>, vector<32x128xf32>, vector<8x128xf32> -> vector<8x128xf32>
    %508 = arith.addf %506, %507 : vector<8x128xf32>
    %509 = vector.extract_strided_slice %508 {offsets = [0, 0], sizes = [8, 96], strides = [1, 1]} : vector<8x128xf32> to vector<8x96xf32>
    %510 = arith.negf %509 : vector<8x96xf32>
    %511 = math.exp %510 : vector<8x96xf32>
    %cst_139 = arith.constant 1.000000e+00 : f32
    %512 = vector.broadcast %cst_139 : f32 to vector<8x96xf32>
    %513 = arith.addf %512, %511 : vector<8x96xf32>
    %514 = arith.divf %512, %513 : vector<8x96xf32>
    %515 = vector.extract_strided_slice %514 {offsets = [0, 0], sizes = [8, 32], strides = [1, 1]} : vector<8x96xf32> to vector<8x32xf32>
    %516 = vector.extract_strided_slice %514 {offsets = [0, 32], sizes = [8, 32], strides = [1, 1]} : vector<8x96xf32> to vector<8x32xf32>
    %517 = vector.extract_strided_slice %514 {offsets = [0, 64], sizes = [8, 32], strides = [1, 1]} : vector<8x96xf32> to vector<8x32xf32>
    %518 = vector.extract_strided_slice %508 {offsets = [0, 96], sizes = [8, 32], strides = [1, 1]} : vector<8x128xf32> to vector<8x32xf32>
    %519 = math.tanh %518 : vector<8x32xf32>
    %520 = arith.mulf %516, %474 : vector<8x32xf32>
    %521 = arith.mulf %515, %519 : vector<8x32xf32>
    %522 = arith.addf %520, %521 : vector<8x32xf32>
    %523 = math.tanh %522 : vector<8x32xf32>
    %524 = arith.mulf %517, %523 : vector<8x32xf32>
    %c8_i32_140 = arith.constant 8 : i32
    %525 = arith.cmpi slt, %502, %c8_i32_140 : i32
    %526 = arith.select %525, %524, %473 : vector<8x32xf32>
    %527 = arith.select %525, %522, %474 : vector<8x32xf32>
    %cst_141 = arith.constant dense<0.000000e+00> : vector<8x128xf32>
    %528 = tpu.matmul %473, %11, %cst_141 {dimension_numbers = #tpu.dot_dimension_numbers<[1], [0], [0], [1], [0, 0, 1, 1], [], []>} : vector<8x32xf32>, vector<32x128xf32>, vector<8x128xf32> -> vector<8x128xf32>
    %cst_142 = arith.constant dense<0.000000e+00> : vector<8x128xf32>
    %529 = tpu.matmul %499, %12, %cst_142 {dimension_numbers = #tpu.dot_dimension_numbers<[1], [0], [0], [1], [0, 0, 1, 1], [], []>} : vector<8x32xf32>, vector<32x128xf32>, vector<8x128xf32> -> vector<8x128xf32>
    %530 = arith.addf %528, %529 : vector<8x128xf32>
    %531 = arith.addf %530, %15 : vector<8x128xf32>
    %532 = vector.extract_strided_slice %531 {offsets = [0, 0], sizes = [8, 96], strides = [1, 1]} : vector<8x128xf32> to vector<8x96xf32>
    %533 = arith.negf %532 : vector<8x96xf32>
    %534 = math.exp %533 : vector<8x96xf32>
    %cst_143 = arith.constant 1.000000e+00 : f32
    %535 = vector.broadcast %cst_143 : f32 to vector<8x96xf32>
    %536 = arith.addf %535, %534 : vector<8x96xf32>
    %537 = arith.divf %535, %536 : vector<8x96xf32>
    %538 = vector.extract_strided_slice %537 {offsets = [0, 0], sizes = [8, 32], strides = [1, 1]} : vector<8x96xf32> to vector<8x32xf32>
    %539 = vector.extract_strided_slice %537 {offsets = [0, 32], sizes = [8, 32], strides = [1, 1]} : vector<8x96xf32> to vector<8x32xf32>
    %540 = vector.extract_strided_slice %537 {offsets = [0, 64], sizes = [8, 32], strides = [1, 1]} : vector<8x96xf32> to vector<8x32xf32>
    %541 = vector.extract_strided_slice %531 {offsets = [0, 96], sizes = [8, 32], strides = [1, 1]} : vector<8x128xf32> to vector<8x32xf32>
    %542 = math.tanh %541 : vector<8x32xf32>
    %543 = arith.mulf %539, %500 : vector<8x32xf32>
    %544 = arith.mulf %538, %542 : vector<8x32xf32>
    %545 = arith.addf %543, %544 : vector<8x32xf32>
    %546 = math.tanh %545 : vector<8x32xf32>
    %547 = arith.mulf %540, %546 : vector<8x32xf32>
    %c1_i32_144 = arith.constant 1 : i32
    %548 = arith.cmpi sge, %502, %c1_i32_144 : i32
    %c1_i32_145 = arith.constant 1 : i32
    %549 = arith.subi %502, %c1_i32_145 : i32
    %c8_i32_146 = arith.constant 8 : i32
    %550 = arith.cmpi slt, %549, %c8_i32_146 : i32
    %551 = arith.andi %548, %550 : i1
    %552 = arith.select %551, %547, %499 : vector<8x32xf32>
    %553 = arith.select %551, %545, %500 : vector<8x32xf32>
    %c10_i32 = arith.constant 10 : i32
    %c12_i32_147 = arith.constant 12 : i32
    %554 = arith.muli %arg0, %c12_i32_147 : i32
    %555 = arith.addi %554, %c10_i32 : i32
    %c8_i32_148 = arith.constant 8 : i32
    %556 = arith.muli %c10_i32, %c8_i32_148 : i32
    %557 = tpu.assume_multiple %556, 8 : i32
    %558 = arith.index_cast %557 : i32 to index
    %c0_149 = arith.constant 0 : index
    %559 = vector.load %arg11[%558, %c0_149] : memref<96x128xf32, #tpu.memory_space<vmem>>, vector<8x128xf32>
    %cst_150 = arith.constant dense<0.000000e+00> : vector<8x128xf32>
    %560 = tpu.matmul %526, %10, %cst_150 {dimension_numbers = #tpu.dot_dimension_numbers<[1], [0], [0], [1], [0, 0, 1, 1], [], []>} : vector<8x32xf32>, vector<32x128xf32>, vector<8x128xf32> -> vector<8x128xf32>
    %561 = arith.addf %559, %560 : vector<8x128xf32>
    %562 = vector.extract_strided_slice %561 {offsets = [0, 0], sizes = [8, 96], strides = [1, 1]} : vector<8x128xf32> to vector<8x96xf32>
    %563 = arith.negf %562 : vector<8x96xf32>
    %564 = math.exp %563 : vector<8x96xf32>
    %cst_151 = arith.constant 1.000000e+00 : f32
    %565 = vector.broadcast %cst_151 : f32 to vector<8x96xf32>
    %566 = arith.addf %565, %564 : vector<8x96xf32>
    %567 = arith.divf %565, %566 : vector<8x96xf32>
    %568 = vector.extract_strided_slice %567 {offsets = [0, 0], sizes = [8, 32], strides = [1, 1]} : vector<8x96xf32> to vector<8x32xf32>
    %569 = vector.extract_strided_slice %567 {offsets = [0, 32], sizes = [8, 32], strides = [1, 1]} : vector<8x96xf32> to vector<8x32xf32>
    %570 = vector.extract_strided_slice %567 {offsets = [0, 64], sizes = [8, 32], strides = [1, 1]} : vector<8x96xf32> to vector<8x32xf32>
    %571 = vector.extract_strided_slice %561 {offsets = [0, 96], sizes = [8, 32], strides = [1, 1]} : vector<8x128xf32> to vector<8x32xf32>
    %572 = math.tanh %571 : vector<8x32xf32>
    %573 = arith.mulf %569, %527 : vector<8x32xf32>
    %574 = arith.mulf %568, %572 : vector<8x32xf32>
    %575 = arith.addf %573, %574 : vector<8x32xf32>
    %576 = math.tanh %575 : vector<8x32xf32>
    %577 = arith.mulf %570, %576 : vector<8x32xf32>
    %c8_i32_152 = arith.constant 8 : i32
    %578 = arith.cmpi slt, %555, %c8_i32_152 : i32
    %579 = arith.select %578, %577, %526 : vector<8x32xf32>
    %580 = arith.select %578, %575, %527 : vector<8x32xf32>
    %cst_153 = arith.constant dense<0.000000e+00> : vector<8x128xf32>
    %581 = tpu.matmul %526, %11, %cst_153 {dimension_numbers = #tpu.dot_dimension_numbers<[1], [0], [0], [1], [0, 0, 1, 1], [], []>} : vector<8x32xf32>, vector<32x128xf32>, vector<8x128xf32> -> vector<8x128xf32>
    %cst_154 = arith.constant dense<0.000000e+00> : vector<8x128xf32>
    %582 = tpu.matmul %552, %12, %cst_154 {dimension_numbers = #tpu.dot_dimension_numbers<[1], [0], [0], [1], [0, 0, 1, 1], [], []>} : vector<8x32xf32>, vector<32x128xf32>, vector<8x128xf32> -> vector<8x128xf32>
    %583 = arith.addf %581, %582 : vector<8x128xf32>
    %584 = arith.addf %583, %15 : vector<8x128xf32>
    %585 = vector.extract_strided_slice %584 {offsets = [0, 0], sizes = [8, 96], strides = [1, 1]} : vector<8x128xf32> to vector<8x96xf32>
    %586 = arith.negf %585 : vector<8x96xf32>
    %587 = math.exp %586 : vector<8x96xf32>
    %cst_155 = arith.constant 1.000000e+00 : f32
    %588 = vector.broadcast %cst_155 : f32 to vector<8x96xf32>
    %589 = arith.addf %588, %587 : vector<8x96xf32>
    %590 = arith.divf %588, %589 : vector<8x96xf32>
    %591 = vector.extract_strided_slice %590 {offsets = [0, 0], sizes = [8, 32], strides = [1, 1]} : vector<8x96xf32> to vector<8x32xf32>
    %592 = vector.extract_strided_slice %590 {offsets = [0, 32], sizes = [8, 32], strides = [1, 1]} : vector<8x96xf32> to vector<8x32xf32>
    %593 = vector.extract_strided_slice %590 {offsets = [0, 64], sizes = [8, 32], strides = [1, 1]} : vector<8x96xf32> to vector<8x32xf32>
    %594 = vector.extract_strided_slice %584 {offsets = [0, 96], sizes = [8, 32], strides = [1, 1]} : vector<8x128xf32> to vector<8x32xf32>
    %595 = math.tanh %594 : vector<8x32xf32>
    %596 = arith.mulf %592, %553 : vector<8x32xf32>
    %597 = arith.mulf %591, %595 : vector<8x32xf32>
    %598 = arith.addf %596, %597 : vector<8x32xf32>
    %599 = math.tanh %598 : vector<8x32xf32>
    %600 = arith.mulf %593, %599 : vector<8x32xf32>
    %c1_i32_156 = arith.constant 1 : i32
    %601 = arith.cmpi sge, %555, %c1_i32_156 : i32
    %c1_i32_157 = arith.constant 1 : i32
    %602 = arith.subi %555, %c1_i32_157 : i32
    %c8_i32_158 = arith.constant 8 : i32
    %603 = arith.cmpi slt, %602, %c8_i32_158 : i32
    %604 = arith.andi %601, %603 : i1
    %605 = arith.select %604, %600, %552 : vector<8x32xf32>
    %606 = arith.select %604, %598, %553 : vector<8x32xf32>
    %c11_i32 = arith.constant 11 : i32
    %c12_i32_159 = arith.constant 12 : i32
    %607 = arith.muli %arg0, %c12_i32_159 : i32
    %608 = arith.addi %607, %c11_i32 : i32
    %c8_i32_160 = arith.constant 8 : i32
    %609 = arith.muli %c11_i32, %c8_i32_160 : i32
    %610 = tpu.assume_multiple %609, 8 : i32
    %611 = arith.index_cast %610 : i32 to index
    %c0_161 = arith.constant 0 : index
    %612 = vector.load %arg11[%611, %c0_161] : memref<96x128xf32, #tpu.memory_space<vmem>>, vector<8x128xf32>
    %cst_162 = arith.constant dense<0.000000e+00> : vector<8x128xf32>
    %613 = tpu.matmul %579, %10, %cst_162 {dimension_numbers = #tpu.dot_dimension_numbers<[1], [0], [0], [1], [0, 0, 1, 1], [], []>} : vector<8x32xf32>, vector<32x128xf32>, vector<8x128xf32> -> vector<8x128xf32>
    %614 = arith.addf %612, %613 : vector<8x128xf32>
    %615 = vector.extract_strided_slice %614 {offsets = [0, 0], sizes = [8, 96], strides = [1, 1]} : vector<8x128xf32> to vector<8x96xf32>
    %616 = arith.negf %615 : vector<8x96xf32>
    %617 = math.exp %616 : vector<8x96xf32>
    %cst_163 = arith.constant 1.000000e+00 : f32
    %618 = vector.broadcast %cst_163 : f32 to vector<8x96xf32>
    %619 = arith.addf %618, %617 : vector<8x96xf32>
    %620 = arith.divf %618, %619 : vector<8x96xf32>
    %621 = vector.extract_strided_slice %620 {offsets = [0, 0], sizes = [8, 32], strides = [1, 1]} : vector<8x96xf32> to vector<8x32xf32>
    %622 = vector.extract_strided_slice %620 {offsets = [0, 32], sizes = [8, 32], strides = [1, 1]} : vector<8x96xf32> to vector<8x32xf32>
    %623 = vector.extract_strided_slice %620 {offsets = [0, 64], sizes = [8, 32], strides = [1, 1]} : vector<8x96xf32> to vector<8x32xf32>
    %624 = vector.extract_strided_slice %614 {offsets = [0, 96], sizes = [8, 32], strides = [1, 1]} : vector<8x128xf32> to vector<8x32xf32>
    %625 = math.tanh %624 : vector<8x32xf32>
    %626 = arith.mulf %622, %580 : vector<8x32xf32>
    %627 = arith.mulf %621, %625 : vector<8x32xf32>
    %628 = arith.addf %626, %627 : vector<8x32xf32>
    %629 = math.tanh %628 : vector<8x32xf32>
    %630 = arith.mulf %623, %629 : vector<8x32xf32>
    %c8_i32_164 = arith.constant 8 : i32
    %631 = arith.cmpi slt, %608, %c8_i32_164 : i32
    %632 = arith.select %631, %630, %579 : vector<8x32xf32>
    %633 = arith.select %631, %628, %580 : vector<8x32xf32>
    %cst_165 = arith.constant dense<0.000000e+00> : vector<8x128xf32>
    %634 = tpu.matmul %579, %11, %cst_165 {dimension_numbers = #tpu.dot_dimension_numbers<[1], [0], [0], [1], [0, 0, 1, 1], [], []>} : vector<8x32xf32>, vector<32x128xf32>, vector<8x128xf32> -> vector<8x128xf32>
    %cst_166 = arith.constant dense<0.000000e+00> : vector<8x128xf32>
    %635 = tpu.matmul %605, %12, %cst_166 {dimension_numbers = #tpu.dot_dimension_numbers<[1], [0], [0], [1], [0, 0, 1, 1], [], []>} : vector<8x32xf32>, vector<32x128xf32>, vector<8x128xf32> -> vector<8x128xf32>
    %636 = arith.addf %634, %635 : vector<8x128xf32>
    %637 = arith.addf %636, %15 : vector<8x128xf32>
    %638 = vector.extract_strided_slice %637 {offsets = [0, 0], sizes = [8, 96], strides = [1, 1]} : vector<8x128xf32> to vector<8x96xf32>
    %639 = arith.negf %638 : vector<8x96xf32>
    %640 = math.exp %639 : vector<8x96xf32>
    %cst_167 = arith.constant 1.000000e+00 : f32
    %641 = vector.broadcast %cst_167 : f32 to vector<8x96xf32>
    %642 = arith.addf %641, %640 : vector<8x96xf32>
    %643 = arith.divf %641, %642 : vector<8x96xf32>
    %644 = vector.extract_strided_slice %643 {offsets = [0, 0], sizes = [8, 32], strides = [1, 1]} : vector<8x96xf32> to vector<8x32xf32>
    %645 = vector.extract_strided_slice %643 {offsets = [0, 32], sizes = [8, 32], strides = [1, 1]} : vector<8x96xf32> to vector<8x32xf32>
    %646 = vector.extract_strided_slice %643 {offsets = [0, 64], sizes = [8, 32], strides = [1, 1]} : vector<8x96xf32> to vector<8x32xf32>
    %647 = vector.extract_strided_slice %637 {offsets = [0, 96], sizes = [8, 32], strides = [1, 1]} : vector<8x128xf32> to vector<8x32xf32>
    %648 = math.tanh %647 : vector<8x32xf32>
    %649 = arith.mulf %645, %606 : vector<8x32xf32>
    %650 = arith.mulf %644, %648 : vector<8x32xf32>
    %651 = arith.addf %649, %650 : vector<8x32xf32>
    %652 = math.tanh %651 : vector<8x32xf32>
    %653 = arith.mulf %646, %652 : vector<8x32xf32>
    %c1_i32_168 = arith.constant 1 : i32
    %654 = arith.cmpi sge, %608, %c1_i32_168 : i32
    %c1_i32_169 = arith.constant 1 : i32
    %655 = arith.subi %608, %c1_i32_169 : i32
    %c8_i32_170 = arith.constant 8 : i32
    %656 = arith.cmpi slt, %655, %c8_i32_170 : i32
    %657 = arith.andi %654, %656 : i1
    %658 = arith.select %657, %653, %605 : vector<8x32xf32>
    %659 = arith.select %657, %651, %606 : vector<8x32xf32>
    %c12_i32_171 = arith.constant 12 : i32
    %c0_172 = arith.constant 0 : index
    %c0_173 = arith.constant 0 : index
    %c0_174 = arith.constant 0 : index
    %660 = vector.load %arg12[%c0_172, %c0_173, %c0_174] : memref<2x8x32xf32, #tpu.memory_space<vmem>>, vector<1x8x32xf32>
    %661 = vector.shape_cast %660 : vector<1x8x32xf32> to vector<8x32xf32>
    %662 = vector.shape_cast %632 : vector<8x32xf32> to vector<1x8x32xf32>
    tpu.vector_store %arg12[%c0_172, %c0_173, %c0_174], %662 {strides = array<i32>} : memref<2x8x32xf32, #tpu.memory_space<vmem>>, vector<1x8x32xf32>,
    %c0_175 = arith.constant 0 : index
    %c0_176 = arith.constant 0 : index
    %c0_177 = arith.constant 0 : index
    %663 = vector.load %arg13[%c0_175, %c0_176, %c0_177] : memref<2x8x32xf32, #tpu.memory_space<vmem>>, vector<1x8x32xf32>
    %664 = vector.shape_cast %663 : vector<1x8x32xf32> to vector<8x32xf32>
    %665 = vector.shape_cast %633 : vector<8x32xf32> to vector<1x8x32xf32>
    tpu.vector_store %arg13[%c0_175, %c0_176, %c0_177], %665 {strides = array<i32>} : memref<2x8x32xf32, #tpu.memory_space<vmem>>, vector<1x8x32xf32>,
    %c1_178 = arith.constant 1 : index
    %c0_179 = arith.constant 0 : index
    %c0_180 = arith.constant 0 : index
    %666 = vector.load %arg12[%c1_178, %c0_179, %c0_180] : memref<2x8x32xf32, #tpu.memory_space<vmem>>, vector<1x8x32xf32>
    %667 = vector.shape_cast %666 : vector<1x8x32xf32> to vector<8x32xf32>
    %668 = vector.shape_cast %658 : vector<8x32xf32> to vector<1x8x32xf32>
    tpu.vector_store %arg12[%c1_178, %c0_179, %c0_180], %668 {strides = array<i32>} : memref<2x8x32xf32, #tpu.memory_space<vmem>>, vector<1x8x32xf32>,
    %c1_181 = arith.constant 1 : index
    %c0_182 = arith.constant 0 : index
    %c0_183 = arith.constant 0 : index
    %669 = vector.load %arg13[%c1_181, %c0_182, %c0_183] : memref<2x8x32xf32, #tpu.memory_space<vmem>>, vector<1x8x32xf32>
    %670 = vector.shape_cast %669 : vector<1x8x32xf32> to vector<8x32xf32>
    %671 = vector.shape_cast %659 : vector<8x32xf32> to vector<1x8x32xf32>
    tpu.vector_store %arg13[%c1_181, %c0_182, %c0_183], %671 {strides = array<i32>} : memref<2x8x32xf32, #tpu.memory_space<vmem>>, vector<1x8x32xf32>,
    %c0_i32_184 = arith.constant 0 : i32
    %672 = arith.cmpi eq, %arg0, %c0_i32_184 : i32
    %673 = arith.extui %672 : i1 to i32
    %c0_i32_185 = arith.constant 0 : i32
    %674 = arith.cmpi ne, %673, %c0_i32_185 : i32
    scf.if %674 {
      %c1_186 = arith.constant 1 : index
      %c0_187 = arith.constant 0 : index
      %c0_188 = arith.constant 0 : index
      %675 = vector.load %arg12[%c1_186, %c0_187, %c0_188] : memref<2x8x32xf32, #tpu.memory_space<vmem>>, vector<1x8x32xf32>
      %676 = vector.shape_cast %675 : vector<1x8x32xf32> to vector<8x32xf32>
      %c0_189 = arith.constant 0 : index
      %c0_190 = arith.constant 0 : index
      %677 = vector.load %arg8[%c0_189, %c0_190] : memref<1x32xf32, #tpu.memory_space<vmem>>, vector<1x32xf32>
      %678 = vector.broadcast %677 : vector<1x32xf32> to vector<8x32xf32>
      %679 = arith.mulf %676, %678 : vector<8x32xf32>
      %cst_191 = arith.constant dense<0.000000e+00> : vector<8xf32>
      %680 = vector.multi_reduction <add>, %679, %cst_191 [1] : vector<8x32xf32> to vector<8xf32>
      %681 = vector.shape_cast %680 : vector<8xf32> to vector<8x1xf32>
      %c0_192 = arith.constant 0 : index
      %c0_193 = arith.constant 0 : index
      %682 = vector.load %arg9[%c0_192, %c0_193] : memref<1x1xf32, #tpu.memory_space<vmem>>, vector<1x1xf32>
      %683 = vector.broadcast %682 : vector<1x1xf32> to vector<8x1xf32>
      %684 = arith.addf %681, %683 : vector<8x1xf32>
      %c0_194 = arith.constant 0 : index
      %c0_195 = arith.constant 0 : index
      %685 = vector.load %arg10[%c0_194, %c0_195] : memref<8x1xf32, #tpu.memory_space<vmem>>, vector<8x1xf32>
      tpu.vector_store %arg10[%c0_194, %c0_195], %684 {strides = array<i32>} : memref<8x1xf32, #tpu.memory_space<vmem>>, vector<8x1xf32>,
    } else {
    }
    return
  }
  func.func @transform_0(%arg0: i32) -> (i32, i32) {
    %c0_i32 = arith.constant 0 : i32
    %c0_i32_0 = arith.constant 0 : i32
    return %arg0, %c0_i32 : i32, i32
  }
  func.func @transform_1(%arg0: i32) -> (i32, i32) {
    %c0_i32 = arith.constant 0 : i32
    %c0_i32_0 = arith.constant 0 : i32
    %c0_i32_1 = arith.constant 0 : i32
    return %c0_i32, %c0_i32_0 : i32, i32
  }
  func.func @transform_2(%arg0: i32) -> (i32, i32) {
    %c0_i32 = arith.constant 0 : i32
    %c0_i32_0 = arith.constant 0 : i32
    %c0_i32_1 = arith.constant 0 : i32
    return %c0_i32, %c0_i32_0 : i32, i32
  }
  func.func @transform_3(%arg0: i32) -> (i32, i32) {
    %c0_i32 = arith.constant 0 : i32
    %c0_i32_0 = arith.constant 0 : i32
    %c0_i32_1 = arith.constant 0 : i32
    return %c0_i32, %c0_i32_0 : i32, i32
  }
  func.func @transform_4(%arg0: i32) -> (i32, i32) {
    %c0_i32 = arith.constant 0 : i32
    %c0_i32_0 = arith.constant 0 : i32
    %c0_i32_1 = arith.constant 0 : i32
    return %c0_i32, %c0_i32_0 : i32, i32
  }
  func.func @transform_5(%arg0: i32) -> (i32, i32) {
    %c0_i32 = arith.constant 0 : i32
    %c0_i32_0 = arith.constant 0 : i32
    %c0_i32_1 = arith.constant 0 : i32
    return %c0_i32, %c0_i32_0 : i32, i32
  }
  func.func @transform_6(%arg0: i32) -> (i32, i32) {
    %c0_i32 = arith.constant 0 : i32
    %c0_i32_0 = arith.constant 0 : i32
    %c0_i32_1 = arith.constant 0 : i32
    return %c0_i32, %c0_i32_0 : i32, i32
  }
  func.func @transform_7(%arg0: i32) -> (i32, i32) {
    %c0_i32 = arith.constant 0 : i32
    %c0_i32_0 = arith.constant 0 : i32
    %c0_i32_1 = arith.constant 0 : i32
    return %c0_i32, %c0_i32_0 : i32, i32
  }
  func.func @transform_8(%arg0: i32) -> (i32, i32) {
    %c0_i32 = arith.constant 0 : i32
    %c0_i32_0 = arith.constant 0 : i32
    %c0_i32_1 = arith.constant 0 : i32
    return %c0_i32, %c0_i32_0 : i32, i32
  }
  func.func @transform_9(%arg0: i32) -> (i32, i32) {
    %c0_i32 = arith.constant 0 : i32
    %c0_i32_0 = arith.constant 0 : i32
    %c0_i32_1 = arith.constant 0 : i32
    return %c0_i32, %c0_i32_0 : i32, i32
  }
}

</mosaic_0001>

<bundles_post_ra>
// kernel: tpu_custom_call.1
= control target key start
LH: loop header
LB: loop body
LE: loop exit
PB: predicated region body
PF: predicated region fallthrough
CT: control target
= control target key end

     0   :  { %vm64_vm0 = vcmask 130048   ;;  %v4811_v0 = vmov 0.0|0.0   ;;  %vm4812_vm1 = vmmov 0   ;;  %v4813_v4 = vmov 0.0   ;;  %s4814_s25 = smov 32   ;;  %s4815_s26 = smov 64   ;;  %s5439_s1 = inlined_call_operand.vmem [shape: f32[16,128], index: 1, kind: input, shape index: {}]   ;;  %s5440_s2 = inlined_call_operand.vmem [shape: f32[32,128], index: 2, kind: input, shape index: {}]   ;;  %s5441_s0 = inlined_call_operand.vmem [shape: f32[96,16], index: 0, kind: input, shape index: {}]   ;;  %s5442_s3 = inlined_call_operand.vmem [shape: f32[1,128], index: 3, kind: input, shape index: {}]   ;;  %s5443_s5 = inlined_call_operand.vmem [shape: f32[32,128], index: 5, kind: input, shape index: {}]   ;;  %s5444_s4 = inlined_call_operand.vmem [shape: f32[32,128], index: 4, kind: input, shape index: {}]   ;;  %s5445_s6 = inlined_call_operand.vmem [shape: f32[1,128], index: 6, kind: input, shape index: {}]   ;;  %s5446_s8 = inlined_call_operand.<no memory space> [shape: f32[1,1], index: 8, kind: input, shape index: {}]   ;;  %s5447_s7 = inlined_call_operand.vmem [shape: f32[1,32], index: 7, kind: input, shape index: {}]   ;;  %s5448_s9 = inlined_call_operand.vmem [shape: f32[8,1], index: 9, kind: output, shape index: {}]  }
   0x1   :  { %4460 = vmatprep.subr.bf16.mxu1 %v4811_v0  ;;  %v55_v1 = vld [vmem:[%s5439_s1] sm:$0xff]  ;;  %v56_v2 = vld [vmem:[%s5439_s1 + $0x8] sm:$0xff]  ;;  %4068 = vmatprep.mubr.msk.f32.mxu1 %vm4812_vm1, %v4813_v4  ;;  %vm38_vm2 = vcmask 261120   ;;  %v240_v9 = vld [vmem:[%s5440_s2 + $0x10] sm:$0xff]  ;;  %vm3762_vm3 = vcmask 7168  }
   0x2   :  { %v238_v3 = vld [vmem:[%s5440_s2] sm:$0xff]  ;;  %v4456_v5 = vpack.c.bf16 %v56_v2, %v55_v1  ;;  %v239_v6 = vld [vmem:[%s5440_s2 + $0x8] sm:$0xff]  ;;  %39 = vst.msk [vmem:[#allocation3] sm:$0xff] %vm38_vm2, %v4813_v4  ;;  %40 = vst.msk [vmem:[#allocation3 + $0x8] sm:$0xff] %vm38_vm2, %v4813_v4 }
   0x3   :  { %v43_v7 = vld [vmem:[%s5441_s0] sm:$0xff]  ;;  %41 = vst.msk [vmem:[#allocation4] sm:$0xff] %vm38_vm2, %v4813_v4  ;;  %42 = vst.msk [vmem:[#allocation4 + $0x8] sm:$0xff] %vm38_vm2, %v4813_v4  ;;  %v4893_v8 = vpack.c.bf16 %v239_v6, %v238_v3  ;;  %v241_v10 = vld [vmem:[%s5440_s2 + $0x18] sm:$0xff] }
   0x4   :  { %4042 = vmatprep.mubr.msk.f32.mxu0 %vm64_vm0, %v43_v7  ;;  %4457 = vmatprep.subr.bf16.mxu0 %v4456_v5  ;;  %v44_v11 = vld [vmem:[%s5441_s0 + $0x8] sm:$0xff]  ;;  %v4906_v12 = vpack.c.bf16 %v241_v10, %v240_v9  ;;  %v4926_v14 = vld [vmem:[%s5442_s3] ss:$0 sm:$0xff]  ;;  %v45_v35 = vld [vmem:[%s5441_s0 + $0x10] sm:$0xff] }
   0x5   :  { %4462 = vmatpush3.bf16.msra.mxu1 %v4893_v8  ;;  %4459 = vmatpush3.bf16.msra.mxu0 %v4456_v5  ;;  %v46_v36 = vld [vmem:[%s5441_s0 + $0x18] sm:$0xff]  ;;  %v47_v37 = vld [vmem:[%s5441_s0 + $0x20] sm:$0xff]  ;;  %v247_v39 = vld [vmem:[%s5443_s5 + $0x8] sm:$0xff] }
   0x6   :  { %4463 = vmatprep.subr.bf16.mxu1 %v4811_v0  ;;  %4478 = vmatprep.subr.bf16.mxu0 %v4811_v0  ;;  %v246_v38 = vld [vmem:[%s5443_s5] sm:$0xff]  ;;  %v248_v41 = vld [vmem:[%s5443_s5 + $0x10] sm:$0xff]  ;;  %v48_v42 = vld [vmem:[%s5441_s0 + $0x28] sm:$0xff] }
   0x7   :  { %v4960_v40 = vpack.c.bf16 %v247_v39, %v246_v38  ;;  %v249_v43 = vld [vmem:[%s5443_s5 + $0x18] sm:$0xff]  ;;  %v49_v44 = vld [vmem:[%s5441_s0 + $0x30] sm:$0xff]  ;;  %v242_v46 = vld [vmem:[%s5444_s4] sm:$0xff] }
   0x8   :  { %4043 = vmatmul.mubr.msk.f32.vlgmr.msra.gmra.mrb[0].mxu0 %vm64_vm0, %v44_v11  ;;  %v4976_v45 = vpack.c.bf16 %v249_v43, %v248_v41  ;;  %v243_v47 = vld [vmem:[%s5444_s4 + $0x8] sm:$0xff]  ;;  %v50_v48 = vld [vmem:[%s5441_s0 + $0x38] sm:$0xff]  ;;  %v51_v49 = vld [vmem:[%s5441_s0 + $0x40] sm:$0xff] }
   0x9   :  { %4465 = vmatpush3.bf16.msra.mxu1 %v4906_v12  ;;  %v4912_v13 = vld [vmem:[#allocation3] sm:$0xff]  ;;  %4480 = vmatpush3.bf16.msra.mxu0 %v4893_v8  ;;  %v259_v29 = vld [vmem:[#allocation3 + $0x8] sm:$0xff]  ;;  %v4995_v50 = vpack.c.bf16 %v243_v47, %v242_v46  ;;  %v244_v52 = vld [vmem:[%s5444_s4 + $0x10] sm:$0xff] }
   0xa   :  { %4466 = vmatprep.subr.bf16.mxu1 %v4811_v0  ;;  %4481 = vmatprep.subr.bf16.mxu0 %v4811_v0  ;;  %v260_v22 = vld [vmem:[#allocation4] sm:$0xff]  ;;  %v245_v53 = vld [vmem:[%s5444_s4 + $0x18] sm:$0xff]  ;;  %v52_v54 = vld [vmem:[%s5441_s0 + $0x48] sm:$0xff] }
   0xb   :  { %4045 = vmatprep.mubr.msk.f32.mxu0 %vm64_vm0, %v45_v35  ;;  %v53_v55 = vld [vmem:[%s5441_s0 + $0x50] sm:$0xff]  ;;  %v5014_v56 = vpack.c.bf16 %v245_v53, %v244_v52  ;;  %v54_v57 = vld [vmem:[%s5441_s0 + $0x58] sm:$0xff] }
   0xc   :  { %4069 = vmatmul.mubr.msk.f32.vlgmr.msra.gmra.mrb[0].mxu1 %vm38_vm2, %v4912_v13  ;;  %4046 = vmatmul.mubr.msk.f32.gmra.mrb[2].mxu0 %vm64_vm0, %v46_v36 }
   0xd   :  { %4483 = vmatpush3.bf16.msra.mxu0 %v4906_v12  ;;  %4079 = vmatprep.mubr.msk.f32.mxu1 %vm4812_vm1, %v4813_v4 }
   0xe   :  { %4490 = vmatprep.subr.bf16.mxu0 %v4811_v0  ;;  %4048 = vmatprep.mubr.msk.f32.mxu0 %vm64_vm0, %v47_v37 }
   0xf   :  { %4468 = vmatpush3.bf16.msra.mxu1 %v4960_v40 }
  0x10   :  { %4469 = vmatprep.subr.bf16.mxu1 %v4811_v0  ;;  %4049 = vmatmul.mubr.msk.f32.gmra.mrb[4].mxu0 %vm64_vm0, %v48_v42 }
  0x11   :  { %4051 = vmatprep.mubr.msk.f32.mxu0 %vm64_vm0, %v49_v44 }
  0x13   :  { %4471 = vmatpush3.bf16.msra.mxu1 %v4976_v45 }
  0x14   :  { %4472 = vmatprep.subr.bf16.mxu1 %v4811_v0  ;;  %4052 = vmatmul.mubr.msk.f32.gmra.mrb[6].mxu0 %vm64_vm0, %v50_v48 }
  0x15   :  { %4054 = vmatprep.mubr.msk.f32.mxu0 %vm64_vm0, %v51_v49 }
  0x16   :  { %4080 = vmatmul.mubr.msk.f32.vlgmr.msra.gmra.mrb[2].mxu1 %vm38_vm2, %v259_v29 }
  0x17   :  { %4474 = vmatpush3.bf16.msra.mxu1 %v4995_v50  ;;  %4090 = vmatprep.mubr.msk.f32.mxu1 %vm4812_vm1, %v4813_v4 }
  0x18   :  { %4055 = vmatmul.mubr.msk.f32.gmra.mrb[8].mxu0 %vm64_vm0, %v52_v54  ;;  %4475 = vmatprep.subr.bf16.mxu1 %v4811_v0 }
  0x19   :  { %4057 = vmatprep.mubr.msk.f32.mxu0 %vm64_vm0, %v53_v55 }
  0x1b   :  { %4477 = vmatpush3.bf16.msra.mxu1 %v5014_v56 }
  0x1c   :  { %4058 = vmatmul.mubr.msk.f32.gmra.mrb[10].mxu0 %vm64_vm0, %v54_v57  ;;  %4484 = vmatprep.subr.bf16.mxu1 %v4811_v0 }
  0x1d   :  { %4101 = vmatprep.mubr.msk.f32.mxu0 %vm4812_vm1, %v4813_v4 }
  0x1e   :  { %4091 = vmatmul.mubr.msk.f32.vlgmr.msra.gmra.mrb[4].mxu1 %vm38_vm2, %v4912_v13 }
  0x1f   :  { %4486 = vmatpush3.bf16.msra.mxu1 %v4960_v40  ;;  %4112 = vmatprep.mubr.msk.f32.mxu1 %vm4812_vm1, %v4813_v4 }
  0x20   :  { %4487 = vmatprep.subr.bf16.mxu1 %v4811_v0 }
  0x23   :  { %4489 = vmatpush3.bf16.msra.mxu1 %v4976_v45 }
  0x24   :  { %4496 = vmatprep.subr.bf16.mxu1 %v4811_v0 }
  0xdb   :  { %v4928_v15 = vpop.f32.mrb[0].mxu0 }
  0xdc   :  { %v167_v16 = vpop.f32.mrb[1].mxu0 }
  0xdd   :  { %v168_v17 = vadd.f32 %v4926_v14, %v167_v16 }
  0xdf   :  { %v335_v18 = vpop.f32.mrb[0].mxu1  ;;  %v5046_v61 = vpop.f32.mrb[2].mxu0 }
  0xe0   :  { %v339_v19 = vadd.f32 %v335_v18, %v168_v17  ;;  %v4070_v20 = vpop.f32.mrb[1].mxu1  ;;  %v5048_v62 = vpop.f32.mrb[3].mxu0 }
  0xe1   :  { %v173_v20 = vadd.f32 %v4928_v15, %v4926_v14  ;;  %v262_v15 = vld [vmem:[#allocation4 + $0x8] sm:$0xff] }
  0xe2   :  { %4682 = vtanh.f32 %v339_v19  ;;  %v3783_v23 = vmul.f32 -1.442695, %v339_v19 }
  0xe3   :  { %v5050_v63 = vpop.f32.mrb[4].mxu0 }
  0xe4   :  { %4684 = vpow2.f32 %v3783_v23  ;;  %v5052_v1 = vpop.f32.mrb[5].mxu0 }
  0xe7   :  { %v5054_v2 = vpop.f32.mrb[6].mxu0 }
  0xe8   :  { %v5056_v3 = vpop.f32.mrb[7].mxu0 }
  0xe9   :  { %v446_v5 = vpop.f32.mrb[2].mxu1 }
  0xea   :  { %v4081_v6 = vpop.f32.mrb[3].mxu1 }
  0xeb   :  { %v4056_v7 = vpop.f32.mrb[8].mxu0  ;;  %v178_v6 = vadd.f32 %v4926_v14, %v5048_v62 }
  0xec   :  { %v4683_v21 = vpop.eup %4682  ;;  %v207_v9 = vpop.f32.mrb[9].mxu0 }
  0xed   :  { %353 = vrot.lane.b32.xlu0 %v4683_v21, %s4814_s25 }
  0xee   :  { %v4685_v24 = vpop.eup %4684 }
  0xef   :  { %v343_v25 = vadd.f32 1.0, %v4685_v24  ;;  %v4059_v10 = vpop.f32.mrb[10].mxu0  ;;  %v5077_v24 = vld [vmem:[%s5445_s6] ss:$0 sm:$0xff] }
  0xf0   :  { %v217_v11 = vpop.f32.mrb[11].mxu0 }
  0xf1   :  { %348 = vrot.lane.b32.xlu0 %v260_v22, %s4814_s25  ;;  %4686 = vrcp.f32 %v343_v25  ;;  %v516_v13 = vpop.f32.mrb[4].mxu1 }
  0xf2   :  { %v4092_v16 = vpop.f32.mrb[5].mxu1 }
  0xf5   :  { %557 = vrot.lane.b32.xlu0 %v259_v29, %s4815_s26 }
  0xfb   :  { %v4933_v26 = vpop.eup %4686 }
 0x15f   :  { %v354_v27 = vpop.permute.xlu0 %353 }
 0x160   :  { %v356_v28 = vmul.f32 %v4933_v26, %v354_v27 }
 0x162   :  { %358 = vrot.lane.b32.xlu1 %v356_v28, %s4814_s25 }
 0x163   :  { %v349_v30 = vpop.permute.xlu0 %348 }
 0x164   :  { %v351_v31 = vmul.f32 %v4933_v26, %v349_v30 }
 0x167   :  { %v558_v34 = vpop.permute.xlu0 %557 }
 0x168   :  { %672 = vrot.lane.b32.xlu0 %v558_v34, %s4815_s26 }
 0x1d4   :  { %v359_v32 = vpop.permute.xlu1 %358 }
 0x1d5   :  { %v4939_v33 = vadd.f32 %v359_v32, %v351_v31 }
 0x1d7   :  { %4688 = vtanh.f32 %v4939_v33 }
 0x1da   :  { %v673_v58 = vpop.permute.xlu0 %672 }
 0x1db   :  { %4113 = vmatmul.mubr.msk.f32.vlgmr.msra.gmra.mrb[6].mxu1 %vm38_vm2, %v673_v58 }
 0x1dc   :  { %4498 = vmatpush3.bf16.msra.mxu1 %v4893_v8  ;;  %4134 = vmatprep.mubr.msk.f32.mxu1 %vm4812_vm1, %v4813_v4 }
 0x1dd   :  { %4499 = vmatprep.subr.bf16.mxu1 %v4811_v0 }
 0x1e0   :  { %4501 = vmatpush3.bf16.msra.mxu1 %v4906_v12 }
 0x1e1   :  { %v4689_v51 = vpop.eup %4688  ;;  %4508 = vmatprep.subr.bf16.mxu1 %v4811_v0 }
 0x1e2   :  { %364 = vrot.lane.b32.xlu1 %v4689_v51, %s4814_s25 }
 0x254   :  { %v365_v59 = vpop.permute.xlu1 %364 }
 0x255   :  { %v367_v60 = vmul.f32 %v4933_v26, %v365_v59 }
 0x257   :  { %566 = vrot.lane.b32.xlu1 %v367_v60, %s4815_s26 }
 0x2ae   :  { %v742_v18 = vpop.f32.mrb[6].mxu1 }
 0x2af   :  { %v4114_v19 = vpop.f32.mrb[7].mxu1 }
 0x2c9   :  { %v567_v17 = vpop.permute.xlu1 %566 }
 0x2ca   :  { %4102 = vmatmul.mubr.msk.f32.vlgmr.msra.gmra.mrb[12].mxu0 %vm38_vm2, %v567_v17 }
 0x2cb   :  { %4492 = vmatpush3.bf16.msra.mxu0 %v4995_v50  ;;  %4123 = vmatprep.mubr.msk.f32.mxu0 %vm4812_vm1, %v4813_v4 }
 0x2cc   :  { %4493 = vmatprep.subr.bf16.mxu0 %v4811_v0 }
 0x2cf   :  { %4495 = vmatpush3.bf16.msra.mxu0 %v5014_v56 }
 0x2d0   :  { %4502 = vmatprep.subr.bf16.mxu0 %v4811_v0 }
 0x2d2   :  { %4124 = vmatmul.mubr.msk.f32.vlgmr.msra.gmra.mrb[14].mxu0 %vm38_vm2, %v567_v17 }
 0x2d3   :  { %4504 = vmatpush3.bf16.msra.mxu0 %v4960_v40  ;;  %4145 = vmatprep.mubr.msk.f32.mxu0 %vm4812_vm1, %v4813_v4 }
 0x2d4   :  { %4505 = vmatprep.subr.bf16.mxu0 %v4811_v0 }
 0x2d7   :  { %4507 = vmatpush3.bf16.msra.mxu0 %v4976_v45 }
 0x2d8   :  { %4514 = vmatprep.subr.bf16.mxu0 %v4811_v0 }
 0x39d   :  { %v636_v21 = vpop.f32.mrb[12].mxu0 }
 0x39e   :  { %v640_v22 = vadd.f32 %v636_v21, %v173_v20  ;;  %v4103_v23 = vpop.f32.mrb[13].mxu0 }
 0x3a0   :  { %4690 = vtanh.f32 %v640_v22  ;;  %v3788_v31 = vmul.f32 -1.442695, %v640_v22 }
 0x3a5   :  { %v812_v25 = vpop.f32.mrb[14].mxu0 }
 0x3a6   :  { %v813_v26 = vadd.f32 %v812_v25, %v742_v18  ;;  %v4125_v27 = vpop.f32.mrb[15].mxu0 }
 0x3a8   :  { %v816_v28 = vadd.f32 %v5077_v24, %v813_v26 }
 0x3aa   :  { %v4691_v29 = vpop.eup %4690  ;;  %4692 = vtanh.f32 %v816_v28  ;;  %v3791_v32 = vmul.f32 -1.442695, %v816_v28 }
 0x3ab   :  { %650 = vrot.lane.b32.xlu1 %v4691_v29, %s4814_s25  ;;  %4694 = vpow2.f32 %v3788_v31 }
 0x3ac   :  { %4696 = vpow2.f32 %v3791_v32 }
 0x3b4   :  { %v4693_v30 = vpop.eup %4692 }
 0x3b5   :  { %826 = vrot.lane.b32.xlu0 %v4693_v30, %s4814_s25  ;;  %v4695_v34 = vpop.eup %4694 }
 0x3b6   :  { %v644_v35 = vadd.f32 1.0, %v4695_v34  ;;  %v4697_v36 = vpop.eup %4696 }
 0x3b7   :  { %v820_v37 = vadd.f32 1.0, %v4697_v36 }
 0x3b8   :  { %4698 = vrcp.f32 %v644_v35 }
 0x3b9   :  { %529 = vrot.lane.b32.xlu0 %v262_v15, %s4814_s25  ;;  %4700 = vrcp.f32 %v820_v37 }
 0x3c2   :  { %v4699_v38 = vpop.eup %4698 }
 0x3c3   :  { %v4701_v42 = vpop.eup %4700  ;;  %v648_v46 = vmul.f32 %v4699_v38, %v4939_v33 }
 0x41d   :  { %v651_v39 = vpop.permute.xlu1 %650 }
 0x41e   :  { %v653_v41 = vmul.f32 %v4699_v38, %v651_v39 }
 0x420   :  { %655 = vrot.lane.b32.xlu1 %v653_v41, %s4814_s25 }
 0x427   :  { %v827_v43 = vpop.permute.xlu0 %826 }
 0x428   :  { %v829_v44 = vmul.f32 %v4701_v42, %v827_v43 }
 0x42a   :  { %831 = vrot.lane.b32.xlu1 %v829_v44, %s4814_s25 }
 0x42b   :  { %v530_v49 = vpop.permute.xlu0 %529 }
 0x42c   :  { %v824_v51 = vmul.f32 %v4701_v42, %v530_v49 }
 0x492   :  { %v656_v47 = vpop.permute.xlu1 %655 }
 0x493   :  { %v5086_v48 = vadd.f32 %v656_v47, %v648_v46 }
 0x495   :  { %4702 = vtanh.f32 %v5086_v48 }
 0x49c   :  { %v832_v52 = vpop.permute.xlu1 %831 }
 0x49d   :  { %v5089_v53 = vadd.f32 %v832_v52, %v824_v51  ;;  %v183_v51 = vadd.f32 %v5046_v61, %v4926_v14 }
 0x49f   :  { %v4703_v54 = vpop.eup %4702  ;;  %4704 = vtanh.f32 %v5089_v53 }
 0x4a0   :  { %661 = vrot.lane.b32.xlu0 %v4703_v54, %s4814_s25 }
 0x4a9   :  { %v4705_v55 = vpop.eup %4704 }
 0x4aa   :  { %837 = vrot.lane.b32.xlu1 %v4705_v55, %s4814_s25 }
 0x512   :  { %v662_v57 = vpop.permute.xlu0 %661 }
 0x513   :  { %v664_v33 = vmul.f32 %v4699_v38, %v662_v57 }
 0x515   :  { %853 = vrot.lane.b32.xlu0 %v664_v33, %s4815_s26 }
 0x51c   :  { %v838_v58 = vpop.permute.xlu1 %837 }
 0x51d   :  { %v840_v59 = vmul.f32 %v4701_v42, %v838_v58 }
 0x51f   :  { %959 = vrot.lane.b32.xlu1 %v840_v59, %s4815_s26 }
 0x587   :  { %v854_v60 = vpop.permute.xlu0 %853 }
 0x588   :  { %4135 = vmatmul.mubr.msk.f32.vlgmr.msra.gmra.mrb[8].mxu1 %vm38_vm2, %v854_v60 }
 0x589   :  { %4510 = vmatpush3.bf16.msra.mxu1 %v4995_v50  ;;  %4156 = vmatprep.mubr.msk.f32.mxu1 %vm4812_vm1, %v4813_v4 }
 0x58a   :  { %4511 = vmatprep.subr.bf16.mxu1 %v4811_v0 }
 0x58d   :  { %4513 = vmatpush3.bf16.msra.mxu1 %v5014_v56 }
 0x58e   :  { %4520 = vmatprep.subr.bf16.mxu1 %v4811_v0 }
 0x590   :  { %4157 = vmatmul.mubr.msk.f32.vlgmr.msra.gmra.mrb[10].mxu1 %vm38_vm2, %v854_v60 }
 0x591   :  { %v960_v5 = vpop.permute.xlu1 %959  ;;  %4522 = vmatpush3.bf16.msra.mxu1 %v4960_v40  ;;  %4178 = vmatprep.mubr.msk.f32.mxu1 %vm4812_vm1, %v4813_v4 }
 0x592   :  { %4146 = vmatmul.mubr.msk.f32.vlgmr.msra.gmra.mrb[16].mxu0 %vm38_vm2, %v960_v5  ;;  %4523 = vmatprep.subr.bf16.mxu1 %v4811_v0 }
 0x593   :  { %4516 = vmatpush3.bf16.msra.mxu0 %v4893_v8  ;;  %4167 = vmatprep.mubr.msk.f32.mxu0 %vm4812_vm1, %v4813_v4 }
 0x594   :  { %4517 = vmatprep.subr.bf16.mxu0 %v4811_v0 }
 0x595   :  { %4525 = vmatpush3.bf16.msra.mxu1 %v4976_v45 }
 0x596   :  { %4532 = vmatprep.subr.bf16.mxu1 %v4811_v0 }
 0x597   :  { %4519 = vmatpush3.bf16.msra.mxu0 %v4906_v12 }
 0x598   :  { %4526 = vmatprep.subr.bf16.mxu0 %v4811_v0 }
 0x65b   :  { %v923_v7 = vpop.f32.mrb[8].mxu1 }
 0x65c   :  { %v927_v9 = vadd.f32 %v923_v7, %v178_v6  ;;  %v4136_v10 = vpop.f32.mrb[9].mxu1 }
 0x65e   :  { %4706 = vtanh.f32 %v927_v9  ;;  %v3793_v22 = vmul.f32 -1.442695, %v927_v9 }
 0x663   :  { %v1099_v11 = vpop.f32.mrb[10].mxu1 }
 0x664   :  { %v4158_v13 = vpop.f32.mrb[11].mxu1 }
 0x665   :  { %v1029_v16 = vpop.f32.mrb[16].mxu0 }
 0x666   :  { %v1100_v17 = vadd.f32 %v1099_v11, %v1029_v16  ;;  %v4147_v18 = vpop.f32.mrb[17].mxu0 }
 0x668   :  { %v4707_v19 = vpop.eup %4706  ;;  %v1103_v20 = vadd.f32 %v5077_v24, %v1100_v17 }
 0x669   :  { %937 = vrot.lane.b32.xlu0 %v4707_v19, %s4814_s25 }
 0x66a   :  { %4708 = vtanh.f32 %v1103_v20  ;;  %v3796_v62 = vmul.f32 -1.442695, %v1103_v20 }
 0x66b   :  { %4710 = vpow2.f32 %v3793_v22 }
 0x66c   :  { %4712 = vpow2.f32 %v3796_v62 }
 0x674   :  { %v4709_v21 = vpop.eup %4708 }
 0x675   :  { %1113 = vrot.lane.b32.xlu1 %v4709_v21, %s4814_s25  ;;  %v4711_v23 = vpop.eup %4710 }
 0x676   :  { %v931_v25 = vadd.f32 1.0, %v4711_v23  ;;  %v4713_v26 = vpop.eup %4712 }
 0x677   :  { %v1107_v27 = vadd.f32 1.0, %v4713_v26 }
 0x678   :  { %4714 = vrcp.f32 %v931_v25 }
 0x679   :  { %4716 = vrcp.f32 %v1107_v27 }
 0x682   :  { %v4715_v28 = vpop.eup %4714 }
 0x683   :  { %v4717_v15 = vpop.eup %4716  ;;  %v935_v34 = vmul.f32 %v4715_v28, %v5086_v48 }
 0x684   :  { %v1111_v37 = vmul.f32 %v4717_v15, %v5089_v53 }
 0x6db   :  { %v938_v29 = vpop.permute.xlu0 %937 }
 0x6dc   :  { %v940_v30 = vmul.f32 %v4715_v28, %v938_v29 }
 0x6de   :  { %942 = vrot.lane.b32.xlu0 %v940_v30, %s4814_s25 }
 0x6e7   :  { %v1114_v31 = vpop.permute.xlu1 %1113 }
 0x6e8   :  { %v1116_v32 = vmul.f32 %v4717_v15, %v1114_v31 }
 0x6ea   :  { %1118 = vrot.lane.b32.xlu1 %v1116_v32, %s4814_s25 }
 0x750   :  { %v943_v35 = vpop.permute.xlu0 %942 }
 0x751   :  { %v5125_v36 = vadd.f32 %v943_v35, %v935_v34 }
 0x753   :  { %4718 = vtanh.f32 %v5125_v36 }
 0x75c   :  { %v1119_v38 = vpop.permute.xlu1 %1118 }
 0x75d   :  { %v4719_v39 = vpop.eup %4718  ;;  %v5129_v41 = vadd.f32 %v1119_v38, %v1111_v37 }
 0x75e   :  { %948 = vrot.lane.b32.xlu0 %v4719_v39, %s4814_s25 }
 0x75f   :  { %4720 = vtanh.f32 %v5129_v41 }
 0x769   :  { %v4721_v42 = vpop.eup %4720 }
 0x76a   :  { %1124 = vrot.lane.b32.xlu1 %v4721_v42, %s4814_s25 }
 0x7d0   :  { %v949_v43 = vpop.permute.xlu0 %948 }
 0x7d1   :  { %v951_v44 = vmul.f32 %v4715_v28, %v949_v43 }
 0x7d3   :  { %1140 = vrot.lane.b32.xlu0 %v951_v44, %s4815_s26 }
 0x7dc   :  { %v1125_v46 = vpop.permute.xlu1 %1124 }
 0x7dd   :  { %v1127_v47 = vmul.f32 %v4717_v15, %v1125_v46 }
 0x7df   :  { %1246 = vrot.lane.b32.xlu1 %v1127_v47, %s4815_s26 }
 0x845   :  { %v1141_v48 = vpop.permute.xlu0 %1140 }
 0x846   :  { %4168 = vmatmul.mubr.msk.f32.vlgmr.msra.gmra.mrb[18].mxu0 %vm38_vm2, %v1141_v48 }
 0x847   :  { %4528 = vmatpush3.bf16.msra.mxu0 %v4995_v50  ;;  %4189 = vmatprep.mubr.msk.f32.mxu0 %vm4812_vm1, %v4813_v4 }
 0x848   :  { %4529 = vmatprep.subr.bf16.mxu0 %v4811_v0 }
 0x84b   :  { %4531 = vmatpush3.bf16.msra.mxu0 %v5014_v56 }
 0x84c   :  { %4538 = vmatprep.subr.bf16.mxu0 %v4811_v0 }
 0x84e   :  { %4190 = vmatmul.mubr.msk.f32.vlgmr.msra.gmra.mrb[20].mxu0 %vm38_vm2, %v1141_v48 }
 0x84f   :  { %4540 = vmatpush3.bf16.msra.mxu0 %v4960_v40  ;;  %4211 = vmatprep.mubr.msk.f32.mxu0 %vm4812_vm1, %v4813_v4 }
 0x850   :  { %4541 = vmatprep.subr.bf16.mxu0 %v4811_v0 }
 0x851   :  { %v1247_v49 = vpop.permute.xlu1 %1246 }
 0x852   :  { %4179 = vmatmul.mubr.msk.f32.vlgmr.msra.gmra.mrb[12].mxu1 %vm38_vm2, %v1247_v49 }
 0x853   :  { %4534 = vmatpush3.bf16.msra.mxu1 %v4893_v8  ;;  %4200 = vmatprep.mubr.msk.f32.mxu1 %vm4812_vm1, %v4813_v4 }
 0x854   :  { %4535 = vmatprep.subr.bf16.mxu1 %v4811_v0  ;;  %4543 = vmatpush3.bf16.msra.mxu0 %v4976_v45 }
 0x855   :  { %4550 = vmatprep.subr.bf16.mxu0 %v4811_v0 }
 0x857   :  { %4537 = vmatpush3.bf16.msra.mxu1 %v4906_v12 }
 0x858   :  { %4544 = vmatprep.subr.bf16.mxu1 %v4811_v0 }
 0x919   :  { %v1210_v52 = vpop.f32.mrb[18].mxu0 }
 0x91a   :  { %v1214_v53 = vadd.f32 %v1210_v52, %v183_v51  ;;  %v4169_v54 = vpop.f32.mrb[19].mxu0 }
 0x91c   :  { %4722 = vtanh.f32 %v1214_v53  ;;  %v3798_v7 = vmul.f32 -1.442695, %v1214_v53 }
 0x921   :  { %v1386_v55 = vpop.f32.mrb[20].mxu0 }
 0x922   :  { %v4191_v57 = vpop.f32.mrb[21].mxu0 }
 0x925   :  { %v1316_v33 = vpop.f32.mrb[12].mxu1 }
 0x926   :  { %v4723_v58 = vpop.eup %4722  ;;  %v1387_v59 = vadd.f32 %v1386_v55, %v1316_v33  ;;  %v4180_v60 = vpop.f32.mrb[13].mxu1 }
 0x927   :  { %1224 = vrot.lane.b32.xlu0 %v4723_v58, %s4814_s25 }
 0x928   :  { %v1390_v5 = vadd.f32 %v5077_v24, %v1387_v59 }
 0x92a   :  { %4724 = vtanh.f32 %v1390_v5  ;;  %v3801_v9 = vmul.f32 -1.442695, %v1390_v5 }
 0x92b   :  { %4726 = vpow2.f32 %v3798_v7 }
 0x92c   :  { %4728 = vpow2.f32 %v3801_v9 }
 0x934   :  { %v4725_v6 = vpop.eup %4724 }
 0x935   :  { %1400 = vrot.lane.b32.xlu1 %v4725_v6, %s4814_s25  ;;  %v4727_v61 = vpop.eup %4726 }
 0x936   :  { %v1218_v10 = vadd.f32 1.0, %v4727_v61  ;;  %v4729_v11 = vpop.eup %4728 }
 0x937   :  { %v1394_v16 = vadd.f32 1.0, %v4729_v11 }
 0x938   :  { %4730 = vrcp.f32 %v1218_v10 }
 0x939   :  { %4732 = vrcp.f32 %v1394_v16 }
 0x942   :  { %v4731_v13 = vpop.eup %4730 }
 0x943   :  { %v4733_v19 = vpop.eup %4732  ;;  %v1222_v22 = vmul.f32 %v4731_v13, %v5125_v36  ;;  %v188_v36 = vadd.f32 %v4926_v14, %v5052_v1 }
 0x944   :  { %v1398_v26 = vmul.f32 %v4733_v19, %v5129_v41 }
 0x999   :  { %v1225_v17 = vpop.permute.xlu0 %1224 }
 0x99a   :  { %v1227_v18 = vmul.f32 %v4731_v13, %v1225_v17 }
 0x99c   :  { %1229 = vrot.lane.b32.xlu0 %v1227_v18, %s4814_s25 }
 0x9a7   :  { %v1401_v20 = vpop.permute.xlu1 %1400 }
 0x9a8   :  { %v1403_v21 = vmul.f32 %v4733_v19, %v1401_v20 }
 0x9aa   :  { %1405 = vrot.lane.b32.xlu1 %v1403_v21, %s4814_s25 }
 0xa0e   :  { %v1230_v62 = vpop.permute.xlu0 %1229 }
 0xa0f   :  { %v5165_v23 = vadd.f32 %v1230_v62, %v1222_v22  ;;  %v193_v62 = vadd.f32 %v5050_v63, %v4926_v14 }
 0xa11   :  { %4734 = vtanh.f32 %v5165_v23 }
 0xa1b   :  { %v4735_v25 = vpop.eup %4734 }
 0xa1c   :  { %v1406_v27 = vpop.permute.xlu1 %1405  ;;  %1235 = vrot.lane.b32.xlu0 %v4735_v25, %s4814_s25 }
 0xa1d   :  { %v5170_v28 = vadd.f32 %v1406_v27, %v1398_v26 }
 0xa1f   :  { %4736 = vtanh.f32 %v5170_v28 }
 0xa29   :  { %v4737_v29 = vpop.eup %4736 }
 0xa2a   :  { %1411 = vrot.lane.b32.xlu1 %v4737_v29, %s4814_s25 }
 0xa8e   :  { %v1236_v30 = vpop.permute.xlu0 %1235 }
 0xa8f   :  { %v1238_v15 = vmul.f32 %v4731_v13, %v1236_v30 }
 0xa91   :  { %1427 = vrot.lane.b32.xlu0 %v1238_v15, %s4815_s26 }
 0xa9c   :  { %v1412_v31 = vpop.permute.xlu1 %1411 }
 0xa9d   :  { %v1414_v32 = vmul.f32 %v4733_v19, %v1412_v31 }
 0xa9f   :  { %1533 = vrot.lane.b32.xlu1 %v1414_v32, %s4815_s26 }
 0xb03   :  { %v1428_v34 = vpop.permute.xlu0 %1427 }
 0xb04   :  { %4201 = vmatmul.mubr.msk.f32.vlgmr.msra.gmra.mrb[14].mxu1 %vm38_vm2, %v1428_v34 }
 0xb05   :  { %4546 = vmatpush3.bf16.msra.mxu1 %v4995_v50  ;;  %4222 = vmatprep.mubr.msk.f32.mxu1 %vm4812_vm1, %v4813_v4 }
 0xb06   :  { %4547 = vmatprep.subr.bf16.mxu1 %v4811_v0 }
 0xb09   :  { %4549 = vmatpush3.bf16.msra.mxu1 %v5014_v56 }
 0xb0a   :  { %4556 = vmatprep.subr.bf16.mxu1 %v4811_v0 }
 0xb0c   :  { %4223 = vmatmul.mubr.msk.f32.vlgmr.msra.gmra.mrb[16].mxu1 %vm38_vm2, %v1428_v34 }
 0xb0d   :  { %4558 = vmatpush3.bf16.msra.mxu1 %v4960_v40  ;;  %4244 = vmatprep.mubr.msk.f32.mxu1 %vm4812_vm1, %v4813_v4 }
 0xb0e   :  { %4559 = vmatprep.subr.bf16.mxu1 %v4811_v0 }
 0xb11   :  { %v1534_v35 = vpop.permute.xlu1 %1533  ;;  %4561 = vmatpush3.bf16.msra.mxu1 %v4976_v45 }
 0xb12   :  { %4212 = vmatmul.mubr.msk.f32.vlgmr.msra.gmra.mrb[22].mxu0 %vm38_vm2, %v1534_v35  ;;  %4568 = vmatprep.subr.bf16.mxu1 %v4811_v0 }
 0xb13   :  { %4552 = vmatpush3.bf16.msra.mxu0 %v4893_v8  ;;  %4233 = vmatprep.mubr.msk.f32.mxu0 %vm4812_vm1, %v4813_v4 }
 0xb14   :  { %4553 = vmatprep.subr.bf16.mxu0 %v4811_v0 }
 0xb17   :  { %4555 = vmatpush3.bf16.msra.mxu0 %v4906_v12 }
 0xb18   :  { %4562 = vmatprep.subr.bf16.mxu0 %v4811_v0 }
 0xbd7   :  { %v1497_v37 = vpop.f32.mrb[14].mxu1 }
 0xbd8   :  { %v1501_v38 = vadd.f32 %v1497_v37, %v188_v36  ;;  %v4202_v39 = vpop.f32.mrb[15].mxu1 }
 0xbda   :  { %4738 = vtanh.f32 %v1501_v38  ;;  %v3803_v51 = vmul.f32 -1.442695, %v1501_v38 }
 0xbdf   :  { %v1673_v41 = vpop.f32.mrb[16].mxu1 }
 0xbe0   :  { %v4224_v42 = vpop.f32.mrb[17].mxu1 }
 0xbe4   :  { %v4739_v43 = vpop.eup %4738 }
 0xbe5   :  { %v1603_v44 = vpop.f32.mrb[22].mxu0  ;;  %1511 = vrot.lane.b32.xlu0 %v4739_v43, %s4814_s25 }
 0xbe6   :  { %v1674_v46 = vadd.f32 %v1673_v41, %v1603_v44  ;;  %v4213_v47 = vpop.f32.mrb[23].mxu0 }
 0xbe8   :  { %v1677_v48 = vadd.f32 %v5077_v24, %v1674_v46 }
 0xbea   :  { %4740 = vtanh.f32 %v1677_v48  ;;  %v3806_v52 = vmul.f32 -1.442695, %v1677_v48 }
 0xbeb   :  { %4742 = vpow2.f32 %v3803_v51 }
 0xbec   :  { %4744 = vpow2.f32 %v3806_v52 }
 0xbf4   :  { %v4741_v49 = vpop.eup %4740 }
 0xbf5   :  { %1687 = vrot.lane.b32.xlu1 %v4741_v49, %s4814_s25  ;;  %v4743_v1 = vpop.eup %4742 }
 0xbf6   :  { %v1505_v53 = vadd.f32 1.0, %v4743_v1  ;;  %v4745_v54 = vpop.eup %4744 }
 0xbf7   :  { %v1681_v58 = vadd.f32 1.0, %v4745_v54 }
 0xbf8   :  { %4746 = vrcp.f32 %v1505_v53 }
 0xbf9   :  { %4748 = vrcp.f32 %v1681_v58 }
 0xc02   :  { %v4747_v55 = vpop.eup %4746 }
 0xc03   :  { %v4749_v59 = vpop.eup %4748  ;;  %v1509_v6 = vmul.f32 %v4747_v55, %v5165_v23 }
 0xc04   :  { %v1685_v10 = vmul.f32 %v4749_v59, %v5170_v28 }
 0xc57   :  { %v1512_v57 = vpop.permute.xlu0 %1511 }
 0xc58   :  { %v1514_v33 = vmul.f32 %v4747_v55, %v1512_v57 }
 0xc5a   :  { %1516 = vrot.lane.b32.xlu0 %v1514_v33, %s4814_s25 }
 0xc67   :  { %v1688_v60 = vpop.permute.xlu1 %1687 }
 0xc68   :  { %v1690_v5 = vmul.f32 %v4749_v59, %v1688_v60 }
 0xc6a   :  { %1692 = vrot.lane.b32.xlu1 %v1690_v5, %s4814_s25 }
 0xccc   :  { %v1517_v7 = vpop.permute.xlu0 %1516 }
 0xccd   :  { %v5205_v61 = vadd.f32 %v1517_v7, %v1509_v6  ;;  %v198_v6 = vadd.f32 %v4926_v14, %v5056_v3 }
 0xccf   :  { %4750 = vtanh.f32 %v5205_v61 }
 0xcd9   :  { %v4751_v9 = vpop.eup %4750 }
 0xcda   :  { %1522 = vrot.lane.b32.xlu0 %v4751_v9, %s4814_s25 }
 0xcdc   :  { %v1693_v11 = vpop.permute.xlu1 %1692 }
 0xcdd   :  { %v5210_v13 = vadd.f32 %v1693_v11, %v1685_v10 }
 0xcdf   :  { %4752 = vtanh.f32 %v5210_v13 }
 0xce9   :  { %v4753_v16 = vpop.eup %4752 }
 0xcea   :  { %1698 = vrot.lane.b32.xlu1 %v4753_v16, %s4814_s25 }
 0xd4c   :  { %v1523_v17 = vpop.permute.xlu0 %1522 }
 0xd4d   :  { %v1525_v18 = vmul.f32 %v4747_v55, %v1523_v17 }
 0xd4f   :  { %1714 = vrot.lane.b32.xlu0 %v1525_v18, %s4815_s26 }
 0xd5c   :  { %v1699_v19 = vpop.permute.xlu1 %1698 }
 0xd5d   :  { %v1701_v20 = vmul.f32 %v4749_v59, %v1699_v19 }
 0xd5f   :  { %1820 = vrot.lane.b32.xlu1 %v1701_v20, %s4815_s26 }
 0xdc1   :  { %v1715_v21 = vpop.permute.xlu0 %1714 }
 0xdc2   :  { %4234 = vmatmul.mubr.msk.f32.vlgmr.msra.gmra.mrb[24].mxu0 %vm38_vm2, %v1715_v21 }
 0xdc3   :  { %4564 = vmatpush3.bf16.msra.mxu0 %v4995_v50  ;;  %4255 = vmatprep.mubr.msk.f32.mxu0 %vm4812_vm1, %v4813_v4 }
 0xdc4   :  { %4565 = vmatprep.subr.bf16.mxu0 %v4811_v0 }
 0xdc7   :  { %4567 = vmatpush3.bf16.msra.mxu0 %v5014_v56 }
 0xdc8   :  { %4574 = vmatprep.subr.bf16.mxu0 %v4811_v0 }
 0xdca   :  { %4256 = vmatmul.mubr.msk.f32.vlgmr.msra.gmra.mrb[26].mxu0 %vm38_vm2, %v1715_v21 }
 0xdcb   :  { %4576 = vmatpush3.bf16.msra.mxu0 %v4960_v40  ;;  %4277 = vmatprep.mubr.msk.f32.mxu0 %vm4812_vm1, %v4813_v4 }
 0xdcc   :  { %4577 = vmatprep.subr.bf16.mxu0 %v4811_v0 }
 0xdcf   :  { %4579 = vmatpush3.bf16.msra.mxu0 %v4976_v45 }
 0xdd0   :  { %4586 = vmatprep.subr.bf16.mxu0 %v4811_v0 }
 0xdd1   :  { %v1821_v22 = vpop.permute.xlu1 %1820 }
 0xdd2   :  { %4245 = vmatmul.mubr.msk.f32.vlgmr.msra.gmra.mrb[18].mxu1 %vm38_vm2, %v1821_v22 }
 0xdd3   :  { %4570 = vmatpush3.bf16.msra.mxu1 %v4893_v8  ;;  %4266 = vmatprep.mubr.msk.f32.mxu1 %vm4812_vm1, %v4813_v4 }
 0xdd4   :  { %4571 = vmatprep.subr.bf16.mxu1 %v4811_v0 }
 0xdd7   :  { %4573 = vmatpush3.bf16.msra.mxu1 %v4906_v12 }
 0xdd8   :  { %4580 = vmatprep.subr.bf16.mxu1 %v4811_v0 }
 0xe95   :  { %v1784_v23 = vpop.f32.mrb[24].mxu0 }
 0xe96   :  { %v1788_v25 = vadd.f32 %v1784_v23, %v193_v62  ;;  %v4235_v26 = vpop.f32.mrb[25].mxu0 }
 0xe98   :  { %4754 = vtanh.f32 %v1788_v25  ;;  %v3808_v35 = vmul.f32 -1.442695, %v1788_v25 }
 0xe9d   :  { %v1960_v27 = vpop.f32.mrb[26].mxu0 }
 0xe9e   :  { %v4257_v28 = vpop.f32.mrb[27].mxu0 }
 0xea2   :  { %v4755_v29 = vpop.eup %4754 }
 0xea3   :  { %1798 = vrot.lane.b32.xlu0 %v4755_v29, %s4814_s25 }
 0xea5   :  { %v1890_v30 = vpop.f32.mrb[18].mxu1 }
 0xea6   :  { %v1961_v15 = vadd.f32 %v1960_v27, %v1890_v30  ;;  %v4246_v31 = vpop.f32.mrb[19].mxu1 }
 0xea8   :  { %v1964_v32 = vadd.f32 %v5077_v24, %v1961_v15 }
 0xeaa   :  { %4756 = vtanh.f32 %v1964_v32  ;;  %v3811_v37 = vmul.f32 -1.442695, %v1964_v32 }
 0xeab   :  { %4758 = vpow2.f32 %v3808_v35 }
 0xeb4   :  { %v4757_v34 = vpop.eup %4756 }
 0xeb5   :  { %1974 = vrot.lane.b32.xlu1 %v4757_v34, %s4814_s25  ;;  %v4759_v63 = vpop.eup %4758 }
 0xeb6   :  { %v1792_v36 = vadd.f32 1.0, %v4759_v63 }
 0xeb8   :  { %4760 = vrcp.f32 %v1792_v36 }
 0xeb9   :  { %4762 = vpow2.f32 %v3811_v37 }
 0xec2   :  { %v4761_v38 = vpop.eup %4760 }
 0xec3   :  { %v4763_v41 = vpop.eup %4762  ;;  %v1796_v48 = vmul.f32 %v4761_v38, %v5205_v61 }
 0xec4   :  { %v1968_v43 = vadd.f32 1.0, %v4763_v41 }
 0xec6   :  { %4764 = vrcp.f32 %v1968_v43 }
 0xed0   :  { %v4765_v44 = vpop.eup %4764 }
 0xed1   :  { %v1972_v52 = vmul.f32 %v4765_v44, %v5210_v13 }
 0xf15   :  { %v1799_v39 = vpop.permute.xlu0 %1798 }
 0xf16   :  { %v1801_v42 = vmul.f32 %v4761_v38, %v1799_v39 }
 0xf18   :  { %1803 = vrot.lane.b32.xlu0 %v1801_v42, %s4814_s25 }
 0xf27   :  { %v1975_v46 = vpop.permute.xlu1 %1974 }
 0xf28   :  { %v1977_v47 = vmul.f32 %v4765_v44, %v1975_v46  ;;  %v4810_v46 = vld [vmem:[%s5442_s3] ss:$0 sm:$0xff]  ;;  %s4816_s3 = smov 96  }
 0xf2a   :  { %1979 = vrot.lane.b32.xlu1 %v1977_v47, %s4814_s25  ;;  %v203_v47 = vadd.f32 %v4810_v46, %v5054_v2 }
 0xf8a   :  { %v1804_v49 = vpop.permute.xlu0 %1803 }
 0xf8b   :  { %v5245_v51 = vadd.f32 %v1804_v49, %v1796_v48 }
 0xf8d   :  { %4766 = vtanh.f32 %v5245_v51 }
 0xf97   :  { %v4767_v1 = vpop.eup %4766 }
 0xf98   :  { %1809 = vrot.lane.b32.xlu0 %v4767_v1, %s4814_s25 }
 0xf9c   :  { %v1980_v53 = vpop.permute.xlu1 %1979 }
 0xf9d   :  { %v5250_v54 = vadd.f32 %v1980_v53, %v1972_v52 }
 0xf9f   :  { %4768 = vtanh.f32 %v5250_v54 }
 0xfa9   :  { %v4769_v55 = vpop.eup %4768 }
 0xfaa   :  { %1985 = vrot.lane.b32.xlu1 %v4769_v55, %s4814_s25 }
0x100a   :  { %v1810_v57 = vpop.permute.xlu0 %1809 }
0x100b   :  { %v1812_v33 = vmul.f32 %v4761_v38, %v1810_v57 }
0x100d   :  { %2001 = vrot.lane.b32.xlu0 %v1812_v33, %s4815_s26 }
0x101c   :  { %v1986_v58 = vpop.permute.xlu1 %1985 }
0x101d   :  { %v1988_v59 = vmul.f32 %v4765_v44, %v1986_v58 }
0x101f   :  { %2107 = vrot.lane.b32.xlu1 %v1988_v59, %s4815_s26 }
0x107f   :  { %v2002_v60 = vpop.permute.xlu0 %2001 }
0x1080   :  { %4267 = vmatmul.mubr.msk.f32.vlgmr.msra.gmra.mrb[20].mxu1 %vm38_vm2, %v2002_v60 }
0x1081   :  { %4582 = vmatpush3.bf16.msra.mxu1 %v4995_v50  ;;  %4288 = vmatprep.mubr.msk.f32.mxu1 %vm4812_vm1, %v4813_v4 }
0x1082   :  { %4583 = vmatprep.subr.bf16.mxu1 %v4811_v0 }
0x1085   :  { %4585 = vmatpush3.bf16.msra.mxu1 %v5014_v56 }
0x1086   :  { %4592 = vmatprep.subr.bf16.mxu1 %v4811_v0 }
0x1088   :  { %4289 = vmatmul.mubr.msk.f32.vlgmr.msra.gmra.mrb[22].mxu1 %vm38_vm2, %v2002_v60 }
0x1089   :  { %4594 = vmatpush3.bf16.msra.mxu1 %v4960_v40  ;;  %4310 = vmatprep.mubr.msk.f32.mxu1 %vm4812_vm1, %v4813_v4 }
0x108a   :  { %4595 = vmatprep.subr.bf16.mxu1 %v4811_v0 }
0x108d   :  { %4597 = vmatpush3.bf16.msra.mxu1 %v4976_v45 }
0x108e   :  { %4604 = vmatprep.subr.bf16.mxu1 %v4811_v0 }
0x1091   :  { %v2108_v5 = vpop.permute.xlu1 %2107 }
0x1092   :  { %4278 = vmatmul.mubr.msk.f32.vlgmr.msra.gmra.mrb[28].mxu0 %vm38_vm2, %v2108_v5 }
0x1093   :  { %4588 = vmatpush3.bf16.msra.mxu0 %v4893_v8  ;;  %4299 = vmatprep.mubr.msk.f32.mxu0 %vm4812_vm1, %v4813_v4 }
0x1094   :  { %4589 = vmatprep.subr.bf16.mxu0 %v4811_v0 }
0x1097   :  { %4591 = vmatpush3.bf16.msra.mxu0 %v4906_v12 }
0x1098   :  { %4598 = vmatprep.subr.bf16.mxu0 %v4811_v0 }
0x1153   :  { %v2071_v7 = vpop.f32.mrb[20].mxu1 }
0x1154   :  { %v2075_v61 = vadd.f32 %v2071_v7, %v198_v6  ;;  %v4268_v9 = vpop.f32.mrb[21].mxu1 }
0x1156   :  { %4770 = vtanh.f32 %v2075_v61  ;;  %v3813_v21 = vmul.f32 -1.442695, %v2075_v61 }
0x115b   :  { %v2247_v10 = vpop.f32.mrb[22].mxu1 }
0x115c   :  { %v4290_v11 = vpop.f32.mrb[23].mxu1 }
0x1160   :  { %v4771_v13 = vpop.eup %4770 }
0x1161   :  { %2085 = vrot.lane.b32.xlu0 %v4771_v13, %s4814_s25 }
0x1165   :  { %v2177_v16 = vpop.f32.mrb[28].mxu0 }
0x1166   :  { %v2248_v17 = vadd.f32 %v2247_v10, %v2177_v16  ;;  %v4279_v18 = vpop.f32.mrb[29].mxu0 }
0x1168   :  { %v2251_v19 = vadd.f32 %v5077_v24, %v2248_v17 }
0x116a   :  { %4772 = vtanh.f32 %v2251_v19  ;;  %v3816_v22 = vmul.f32 -1.442695, %v2251_v19 }
0x116b   :  { %4774 = vpow2.f32 %v3813_v21 }
0x1174   :  { %v4773_v20 = vpop.eup %4772 }
0x1175   :  { %2261 = vrot.lane.b32.xlu1 %v4773_v20, %s4814_s25  ;;  %v4775_v14 = vpop.eup %4774 }
0x1176   :  { %v2079_v3 = vadd.f32 1.0, %v4775_v14 }
0x1178   :  { %4776 = vrcp.f32 %v2079_v3 }
0x1179   :  { %4778 = vpow2.f32 %v3816_v22 }
0x1182   :  { %v4777_v62 = vpop.eup %4776 }
0x1183   :  { %v4779_v26 = vpop.eup %4778  ;;  %v2083_v15 = vmul.f32 %v4777_v62, %v5245_v51 }
0x1184   :  { %v2255_v27 = vadd.f32 1.0, %v4779_v26 }
0x1186   :  { %4780 = vrcp.f32 %v2255_v27 }
0x1190   :  { %v4781_v28 = vpop.eup %4780 }
0x1191   :  { %v2259_v35 = vmul.f32 %v4781_v28, %v5250_v54 }
0x11d3   :  { %v2086_v23 = vpop.permute.xlu0 %2085 }
0x11d4   :  { %v2088_v25 = vmul.f32 %v4777_v62, %v2086_v23 }
0x11d6   :  { %2090 = vrot.lane.b32.xlu0 %v2088_v25, %s4814_s25 }
0x11e7   :  { %v2262_v29 = vpop.permute.xlu1 %2261 }
0x11e8   :  { %v2264_v30 = vmul.f32 %v4781_v28, %v2262_v29 }
0x11ea   :  { %2266 = vrot.lane.b32.xlu1 %v2264_v30, %s4814_s25 }
0x1248   :  { %v2091_v31 = vpop.permute.xlu0 %2090 }
0x1249   :  { %v5285_v32 = vadd.f32 %v2091_v31, %v2083_v15 }
0x124b   :  { %4782 = vtanh.f32 %v5285_v32 }
0x1255   :  { %v4783_v34 = vpop.eup %4782 }
0x1256   :  { %2096 = vrot.lane.b32.xlu0 %v4783_v34, %s4814_s25 }
0x125c   :  { %v2267_v63 = vpop.permute.xlu1 %2266 }
0x125d   :  { %v5290_v36 = vadd.f32 %v2267_v63, %v2259_v35 }
0x125f   :  { %4784 = vtanh.f32 %v5290_v36 }
0x1269   :  { %v4785_v37 = vpop.eup %4784 }
0x126a   :  { %2272 = vrot.lane.b32.xlu1 %v4785_v37, %s4814_s25 }
0x12c8   :  { %v2097_v38 = vpop.permute.xlu0 %2096 }
0x12c9   :  { %v2099_v39 = vmul.f32 %v4777_v62, %v2097_v38 }
0x12cb   :  { %2288 = vrot.lane.b32.xlu0 %v2099_v39, %s4815_s26 }
0x12dc   :  { %v2273_v41 = vpop.permute.xlu1 %2272 }
0x12dd   :  { %v2275_v42 = vmul.f32 %v4781_v28, %v2273_v41 }
0x12df   :  { %2394 = vrot.lane.b32.xlu1 %v2275_v42, %s4815_s26 }
0x133d   :  { %v2289_v43 = vpop.permute.xlu0 %2288 }
0x133e   :  { %4300 = vmatmul.mubr.msk.f32.vlgmr.msra.gmra.mrb[30].mxu0 %vm38_vm2, %v2289_v43 }
0x133f   :  { %4600 = vmatpush3.bf16.msra.mxu0 %v4995_v50  ;;  %4321 = vmatprep.mubr.msk.f32.mxu0 %vm4812_vm1, %v4813_v4 }
0x1340   :  { %4601 = vmatprep.subr.bf16.mxu0 %v4811_v0 }
0x1343   :  { %4603 = vmatpush3.bf16.msra.mxu0 %v5014_v56 }
0x1344   :  { %4610 = vmatprep.subr.bf16.mxu0 %v4811_v0 }
0x1346   :  { %4322 = vmatmul.mubr.msk.f32.vlgmr.msra.gmra.mrb[32].mxu0 %vm38_vm2, %v2289_v43 }
0x1347   :  { %4612 = vmatpush3.bf16.msra.mxu0 %v4960_v40  ;;  %4343 = vmatprep.mubr.msk.f32.mxu0 %vm4812_vm1, %v4813_v4 }
0x1348   :  { %4613 = vmatprep.subr.bf16.mxu0 %v4811_v0 }
0x134b   :  { %4615 = vmatpush3.bf16.msra.mxu0 %v4976_v45 }
0x134c   :  { %4622 = vmatprep.subr.bf16.mxu0 %v4811_v0 }
0x1351   :  { %v2395_v44 = vpop.permute.xlu1 %2394 }
0x1352   :  { %4311 = vmatmul.mubr.msk.f32.vlgmr.msra.gmra.mrb[24].mxu1 %vm38_vm2, %v2395_v44 }
0x1353   :  { %4606 = vmatpush3.bf16.msra.mxu1 %v4893_v8  ;;  %4332 = vmatprep.mubr.msk.f32.mxu1 %vm4812_vm1, %v4813_v4 }
0x1354   :  { %4607 = vmatprep.subr.bf16.mxu1 %v4811_v0 }
0x1357   :  { %4609 = vmatpush3.bf16.msra.mxu1 %v4906_v12 }
0x1358   :  { %4616 = vmatprep.subr.bf16.mxu1 %v4811_v0 }
0x1411   :  { %v2358_v48 = vpop.f32.mrb[30].mxu0 }
0x1412   :  { %v2362_v49 = vadd.f32 %v2358_v48, %v203_v47  ;;  %v4301_v51 = vpop.f32.mrb[31].mxu0 }
0x1414   :  { %4786 = vtanh.f32 %v2362_v49  ;;  %v3818_v59 = vmul.f32 -1.442695, %v2362_v49 }
0x1419   :  { %v2534_v1 = vpop.f32.mrb[32].mxu0 }
0x141a   :  { %v4323_v52 = vpop.f32.mrb[33].mxu0 }
0x141e   :  { %v4787_v53 = vpop.eup %4786 }
0x141f   :  { %2372 = vrot.lane.b32.xlu0 %v4787_v53, %s4814_s25 }
0x1425   :  { %v2464_v54 = vpop.f32.mrb[24].mxu1 }
0x1426   :  { %v2535_v55 = vadd.f32 %v2534_v1, %v2464_v54  ;;  %v4312_v57 = vpop.f32.mrb[25].mxu1  ;;  %v14_v1 = vstv %s5446_s8 }
0x1427   :  { %15 = vst [vmem:[#allocation5] sm:$0x1] %v14_v1 }
0x1428   :  { %v2538_v33 = vadd.f32 %v5077_v24, %v2535_v55 }
0x142a   :  { %4788 = vtanh.f32 %v2538_v33  ;;  %v3821_v5 = vmul.f32 -1.442695, %v2538_v33 }
0x142b   :  { %4790 = vpow2.f32 %v3818_v59 }
0x1434   :  { %v4789_v58 = vpop.eup %4788 }
0x1435   :  { %2548 = vrot.lane.b32.xlu1 %v4789_v58, %s4814_s25  ;;  %v4791_v2 = vpop.eup %4790 }
0x1436   :  { %v2366_v60 = vadd.f32 1.0, %v4791_v2 }
0x1438   :  { %4792 = vrcp.f32 %v2366_v60 }
0x1439   :  { %4794 = vpow2.f32 %v3821_v5  ;;  %v3842_v5 = vld [vmem:[%s5447_s7] ss:$0 sm:$0xff] }
0x1442   :  { %v4793_v6 = vpop.eup %4792 }
0x1443   :  { %v4795_v9 = vpop.eup %4794  ;;  %v2370_v17 = vmul.f32 %v4793_v6, %v5285_v32 }
0x1444   :  { %v2542_v10 = vadd.f32 1.0, %v4795_v9 }
0x1446   :  { %4796 = vrcp.f32 %v2542_v10 }
0x1450   :  { %v4797_v11 = vpop.eup %4796 }
0x1451   :  { %v2546_v21 = vmul.f32 %v4797_v11, %v5290_v36 }
0x1491   :  { %v2373_v7 = vpop.permute.xlu0 %2372 }
0x1492   :  { %v2375_v61 = vmul.f32 %v4793_v6, %v2373_v7 }
0x1494   :  { %2377 = vrot.lane.b32.xlu0 %v2375_v61, %s4814_s25 }
0x14a7   :  { %v2549_v13 = vpop.permute.xlu1 %2548 }
0x14a8   :  { %v2551_v16 = vmul.f32 %v4797_v11, %v2549_v13 }
0x14aa   :  { %2553 = vrot.lane.b32.xlu1 %v2551_v16, %s4814_s25 }
0x1506   :  { %v2378_v18 = vpop.permute.xlu0 %2377 }
0x1507   :  { %v5327_v19 = vadd.f32 %v2378_v18, %v2370_v17 }
0x1509   :  { %4798 = vtanh.f32 %v5327_v19 }
0x1513   :  { %v4799_v20 = vpop.eup %4798 }
0x1514   :  { %2383 = vrot.lane.b32.xlu0 %v4799_v20, %s4814_s25 }
0x151c   :  { %v2554_v14 = vpop.permute.xlu1 %2553 }
0x151d   :  { %v2556_v3 = vadd.f32 %v2554_v14, %v2546_v21 }
0x151f   :  { %4800 = vtanh.f32 %v2556_v3 }
0x1529   :  { %v4801_v22 = vpop.eup %4800 }
0x152a   :  { %2559 = vrot.lane.b32.xlu1 %v4801_v22, %s4814_s25 }
0x1586   :  { %v2384_v62 = vpop.permute.xlu0 %2383 }
0x1587   :  { %v5333_v23 = vmul.f32 %v4793_v6, %v2384_v62 }
0x1589   :  { %2575 = vrot.lane.b32.xlu0 %v5333_v23, %s4815_s26 }
0x159c   :  { %v2560_v25 = vpop.permute.xlu1 %2559 }
0x159d   :  { %v2562_v26 = vmul.f32 %v4797_v11, %v2560_v25 }
0x159f   :  { %2681 = vrot.lane.b32.xlu1 %v2562_v26, %s4815_s26 }
0x15fb   :  { %v2576_v27 = vpop.permute.xlu0 %2575 }
0x15fc   :  { %4333 = vmatmul.mubr.msk.f32.vlgmr.msra.gmra.mrb[26].mxu1 %vm38_vm2, %v2576_v27 }
0x15fd   :  { %4618 = vmatpush3.bf16.msra.mxu1 %v4995_v50  ;;  %4354 = vmatprep.mubr.msk.f32.mxu1 %vm4812_vm1, %v4813_v4 }
0x15fe   :  { %4619 = vmatprep.subr.bf16.mxu1 %v4811_v0 }
0x1601   :  { %4621 = vmatpush3.bf16.msra.mxu1 %v5014_v56 }
0x1602   :  { %4628 = vmatprep.subr.bf16.mxu1 %v4811_v0 }
0x1604   :  { %4355 = vmatmul.mubr.msk.f32.vlgmr.msra.gmra.mrb[28].mxu1 %vm38_vm2, %v2576_v27 }
0x1605   :  { %4630 = vmatpush3.bf16.msra.mxu1 %v4960_v40  ;;  %4376 = vmatprep.mubr.msk.f32.mxu1 %vm4812_vm1, %v4813_v4 }
0x1606   :  { %4631 = vmatprep.subr.bf16.mxu1 %v4811_v0 }
0x1609   :  { %4633 = vmatpush3.bf16.msra.mxu1 %v4976_v45 }
0x160a   :  { %4640 = vmatprep.subr.bf16.mxu1 %v4811_v0 }
0x1611   :  { %v2682_v28 = vpop.permute.xlu1 %2681 }
0x1612   :  { %4344 = vmatmul.mubr.msk.f32.vlgmr.msra.gmra.mrb[34].mxu0 %vm38_vm2, %v2682_v28 }
0x1613   :  { %4624 = vmatpush3.bf16.msra.mxu0 %v4893_v8  ;;  %4365 = vmatprep.mubr.msk.f32.mxu0 %vm4812_vm1, %v4813_v4 }
0x1614   :  { %4625 = vmatprep.subr.bf16.mxu0 %v4811_v0 }
0x1617   :  { %4627 = vmatpush3.bf16.msra.mxu0 %v4906_v12 }
0x1618   :  { %4634 = vmatprep.subr.bf16.mxu0 %v4811_v0 }
0x16cf   :  { %v2645_v29 = vpop.f32.mrb[26].mxu1 }
0x16d0   :  { %v4334_v30 = vpop.f32.mrb[27].mxu1 }
0x16d7   :  { %v2821_v15 = vpop.f32.mrb[28].mxu1 }
0x16d8   :  { %v4356_v31 = vpop.f32.mrb[29].mxu1 }
0x16e5   :  { %v2751_v32 = vpop.f32.mrb[34].mxu0 }
0x16e6   :  { %v2822_v34 = vadd.f32 %v2821_v15, %v2751_v32  ;;  %v4345_v35 = vpop.f32.mrb[35].mxu0 }
0x16e8   :  { %v2825_v63 = vadd.f32 %v5077_v24, %v2822_v34 }
0x16ea   :  { %4802 = vtanh.f32 %v2825_v63  ;;  %v3826_v37 = vmul.f32 -1.442695, %v2825_v63 }
0x16ec   :  { %4804 = vpow2.f32 %v3826_v37 }
0x16f4   :  { %v4803_v36 = vpop.eup %4802 }
0x16f5   :  { %2835 = vrot.lane.b32.xlu0 %v4803_v36, %s4814_s25 }
0x16f6   :  { %v4805_v38 = vpop.eup %4804 }
0x16f7   :  { %v2829_v39 = vadd.f32 1.0, %v4805_v38 }
0x16f9   :  { %4806 = vrcp.f32 %v2829_v39 }
0x1703   :  { %v4807_v41 = vpop.eup %4806 }
0x1704   :  { %v2833_v24 = vmul.f32 %v4807_v41, %v2556_v3 }
0x1767   :  { %v2836_v42 = vpop.permute.xlu0 %2835 }
0x1768   :  { %v2838_v43 = vmul.f32 %v4807_v41, %v2836_v42 }
0x176a   :  { %2840 = vrot.lane.b32.xlu1 %v2838_v43, %s4814_s25 }
0x176e   :  { %2862 = vrot.lane.b32.xlu1 %v5333_v23, %s4815_s26 }
0x1772   :  { %3149 = vrot.lane.b32.xlu1 %v5333_v23, %s4815_s26 }
0x1776   :  { %3436 = vrot.lane.b32.xlu1 %v5333_v23, %s4815_s26 }
0x17dc   :  { %v2841_v44 = vpop.permute.xlu1 %2840 }
0x17dd   :  { %v2843_v46 = vadd.f32 %v2841_v44, %v2833_v24 }
0x17df   :  { %4808 = vtanh.f32 %v2843_v46 }
0x17e0   :  { %v2863_v47 = vpop.permute.xlu1 %2862 }
0x17e1   :  { %4366 = vmatmul.mubr.msk.f32.vlgmr.msra.gmra.mrb[36].mxu0 %vm38_vm2, %v2863_v47 }
0x17e2   :  { %4636 = vmatpush3.bf16.msra.mxu0 %v4995_v50  ;;  %4387 = vmatprep.mubr.msk.f32.mxu0 %vm4812_vm1, %v4813_v4 }
0x17e3   :  { %4637 = vmatprep.subr.bf16.mxu0 %v4811_v0 }
0x17e4   :  { %v3150_v57 = vpop.permute.xlu1 %3149 }
0x17e6   :  { %4639 = vmatpush3.bf16.msra.mxu0 %v5014_v56 }
0x17e7   :  { %4646 = vmatprep.subr.bf16.mxu0 %v4811_v0 }
0x17e8   :  { %v3437_v33 = vpop.permute.xlu1 %3436 }
0x17e9   :  { %v4809_v48 = vpop.eup %4808  ;;  %4388 = vmatmul.mubr.msk.f32.vlgmr.msra.gmra.mrb[38].mxu0 %vm38_vm2, %v2863_v47 }
0x17ea   :  { %2846 = vrot.lane.b32.xlu0 %v4809_v48, %s4814_s25  ;;  %4648 = vmatpush3.bf16.msra.mxu0 %v4960_v40 }
0x17eb   :  { %4649 = vmatprep.subr.bf16.mxu0 %v4811_v0  ;;  %4409 = vmatprep.mubr.msk.f32.mxu0 %vm4812_vm1, %v4813_v4 }
0x17ee   :  { %4651 = vmatpush3.bf16.msra.mxu0 %v4976_v45 }
0x17ef   :  { %4658 = vmatprep.subr.bf16.mxu0 %v4811_v0 }
0x185c   :  { %v2847_v49 = vpop.permute.xlu0 %2846 }
0x185d   :  { %v2849_v51 = vmul.f32 %v4807_v41, %v2847_v49 }
0x185f   :  { %3730 = vrot.lane.b32.xlu1 %v2849_v51, %s4815_s26  ;;  %2968 = vrot.lane.b32.xlu0 %v2849_v51, %s4815_s26 }
0x1863   :  { %3720 = vrot.lane.b32.xlu1 %v5333_v23, %s4815_s26  ;;  %3255 = vrot.lane.b32.xlu0 %v2849_v51, %s4815_s26 }
0x1867   :  { %3725 = vrot.lane.b32.xlu1 %v5327_v19, %s4816_s3  ;;  %3542 = vrot.lane.b32.xlu0 %v2849_v51, %s4815_s26 }
0x186b   :  { %3735 = vrot.lane.b32.xlu1 %v2843_v46, %s4816_s3 }
0x18b4   :  { %v2932_v52 = vpop.f32.mrb[36].mxu0 }
0x18b5   :  { %v4367_v53 = vpop.f32.mrb[37].mxu0 }
0x18bc   :  { %v3108_v54 = vpop.f32.mrb[38].mxu0 }
0x18bd   :  { %v4389_v55 = vpop.f32.mrb[39].mxu0 }
0x18d1   :  { %v3731_v58 = vpop.permute.xlu1 %3730  ;;  %v2969_v59 = vpop.permute.xlu0 %2968 }
0x18d2   :  { %3733 = vst.msk [vmem:[#allocation3 + $0x8] sm:$0xff] %vm38_vm2, %v3731_v58  ;;  %4377 = vmatmul.mubr.msk.f32.vlgmr.msra.gmra.mrb[30].mxu1 %vm38_vm2, %v2969_v59 }
0x18d3   :  { %4642 = vmatpush3.bf16.msra.mxu1 %v4893_v8  ;;  %4398 = vmatprep.mubr.msk.f32.mxu1 %vm4812_vm1, %v4813_v4 }
0x18d4   :  { %4643 = vmatprep.subr.bf16.mxu1 %v4811_v0 }
0x18d5   :  { %v3721_v2 = vpop.permute.xlu1 %3720  ;;  %v3256_v60 = vpop.permute.xlu0 %3255 }
0x18d6   :  { %3723 = vst.msk [vmem:[#allocation3] sm:$0xff] %vm38_vm2, %v3721_v2  ;;  %4410 = vmatmul.mubr.msk.f32.vlgmr.msra.gmra.mrb[40].mxu0 %vm38_vm2, %v3256_v60 }
0x18d7   :  { %4645 = vmatpush3.bf16.msra.mxu1 %v4906_v12  ;;  %4660 = vmatpush3.bf16.msra.mxu0 %v4893_v8 }
0x18d8   :  { %4652 = vmatprep.subr.bf16.mxu1 %v4811_v0  ;;  %4661 = vmatprep.subr.bf16.mxu0 %v4811_v0 }
0x18d9   :  { %v3726_v6 = vpop.permute.xlu1 %3725  ;;  %4431 = vmatprep.mubr.msk.f32.mxu0 %vm4812_vm1, %v4813_v4  ;;  %v3742_v7 = vld [vmem:[#allocation3 + $0x8] sm:$0xff] }
0x18da   :  { %3728 = vst.msk [vmem:[#allocation4] sm:$0xff] %vm38_vm2, %v3726_v6  ;;  %4399 = vmatmul.mubr.msk.f32.vlgmr.msra.gmra.mrb[32].mxu1 %vm38_vm2, %v3150_v57  ;;  %v3750_v61 = vmul.f32 %v3842_v5, %v3742_v7 }
0x18db   :  { %4654 = vmatpush3.bf16.msra.mxu1 %v4995_v50  ;;  %4663 = vmatpush3.bf16.msra.mxu0 %v4906_v12  ;;  %v3543_v12 = vpop.permute.xlu0 %3542 }
0x18dc   :  { %v3751_v8 = vsel %vm38_vm2, %v3750_v61, 0.0  ;;  %4655 = vmatprep.subr.bf16.mxu1 %v4811_v0  ;;  %4670 = vmatprep.subr.bf16.mxu0 %v4811_v0 }
0x18dd   :  { %v3736_v9 = vpop.permute.xlu1 %3735  ;;  %3752 = vadd.xlane.f32.xlu0 %v3751_v8  ;;  %4420 = vmatprep.mubr.msk.f32.mxu1 %vm4812_vm1, %v4813_v4 }
0x18de   :  { %3738 = vst.msk [vmem:[#allocation4 + $0x8] sm:$0xff] %vm38_vm2, %v3736_v9  ;;  %4432 = vmatmul.mubr.msk.f32.vlgmr.msra.gmra.mrb[42].mxu0 %vm38_vm2, %v3437_v33 }
0x18df   :  { %4657 = vmatpush3.bf16.msra.mxu1 %v5014_v56  ;;  %4672 = vmatpush3.bf16.msra.mxu0 %v4995_v50  ;;  %v3843_v50 = vld [vmem:[#allocation5] ss:$0 sm:$0xff] }
0x18e0   :  { %4664 = vmatprep.subr.bf16.mxu1 %v4811_v0  ;;  %4673 = vmatprep.subr.bf16.mxu0 %v4811_v0 }
0x18e1   :  { %4453 = vmatprep.mubr.msk.f32.mxu0 %vm4812_vm1, %v4813_v4 }
0x18e2   :  { %4421 = vmatmul.mubr.msk.f32.vlgmr.msra.gmra.mrb[34].mxu1 %vm38_vm2, %v3150_v57 }
0x18e3   :  { %4666 = vmatpush3.bf16.msra.mxu1 %v4960_v40  ;;  %4675 = vmatpush3.bf16.msra.mxu0 %v5014_v56 }
0x18e4   :  { %4667 = vmatprep.subr.bf16.mxu1 %v4811_v0  ;;  %4442 = vmatprep.mubr.msk.f32.mxu1 %vm4812_vm1, %v4813_v4 }
0x18e6   :  { %4454 = vmatmul.mubr.msk.f32.vlgmr.msra.gmra.mrb[44].mxu0 %vm38_vm2, %v3437_v33 }
0x18e7   :  { %4669 = vmatpush3.bf16.msra.mxu1 %v4976_v45 }
0x18ea   :  { %4443 = vmatmul.mubr.msk.f32.vlgmr.msra.gmra.mrb[36].mxu1 %vm38_vm2, %v3543_v12 }
0x196a   :  { %v3753_v10 = vpop.xlane.xlu0 %3752 }
0x196b   :  { %v3761_v11 = vadd.f32 %v3843_v50, %v3753_v10 }
0x196d   :  { %3763 = vst.msk [vmem:[%s5448_s9] sm:$0xff] %vm3762_vm3, %v3761_v11 }
0x19a5   :  { %v3038_v40 = vpop.f32.mrb[30].mxu1 }
0x19a6   :  { %v4378_v0 = vpop.f32.mrb[31].mxu1 }
0x19a9   :  { %v3325_v56 = vpop.f32.mrb[40].mxu0 }
0x19aa   :  { %v4411_v13 = vpop.f32.mrb[41].mxu0 }
0x19ad   :  { %v3219_v4 = vpop.f32.mrb[32].mxu1 }
0x19ae   :  { %v4400_v16 = vpop.f32.mrb[33].mxu1 }
0x19b1   :  { %v3506_v17 = vpop.f32.mrb[42].mxu0 }
0x19b2   :  { %v4433_v18 = vpop.f32.mrb[43].mxu0 }
0x19b5   :  { %v3395_v45 = vpop.f32.mrb[34].mxu1 }
0x19b6   :  { %v4422_v19 = vpop.f32.mrb[35].mxu1 }
0x19b9   :  { %v3682_v20 = vpop.f32.mrb[44].mxu0 }
0x19ba   :  { %v4455_v21 = vpop.f32.mrb[45].mxu0 }
0x19bd   :  { %v3612_v14 = vpop.f32.mrb[36].mxu1 }
0x19be   :  { %v4444_v3 = vpop.f32.mrb[37].mxu1 }

</bundles_post_ra>
